<compile_context>
chip_gen: v6e
topology: v6e:2x2x1
jax: 0.10.0
libtpu: 0.0.40
codegen_flags: <defaults>
</compile_context>

<pallas_src>
import functools
import math

import jax
import jax.numpy as jnp
from jax.experimental import pallas as pl
from jax.experimental.pallas import tpu as pltpu

NEG_SLOPE = 0.01                 # LeakyReLU(0.01)
LANE = 128                       # lane-dense padding target (last dim)
SUBLANE = 8                      # sublane padding target (second-minor dim)
TM_MAX = 512                     # max rows per matmul tile (v7x-friendly)
TK_MAX = 512                     # max contraction chunk per matmul tile
VMEM_LIMIT = 64 * 1024 * 1024


def _ceil_to(x, m):
    return -(-x // m) * m


def _choose_tile(dim, tile_max, align):
    """Tile size <= tile_max (multiple of `align`) minimizing zero padding."""
    d = _ceil_to(dim, align)
    n = -(-d // tile_max)
    t = _ceil_to(-(-d // n), align)
    return t, _ceil_to(d, t)


# ----------------------------------------------------------------------------
# Pallas kernels
# ----------------------------------------------------------------------------
def _stacked_linear_kernel(x_ref, w_ref, b_ref, o_ref, acc_ref, *, apply_act):
    """One (TM,TK)x(TK,N) bf16 MXU step with f32 accumulation.

    grid = (view, m_tile, k_tile); k is the innermost (reduction) axis.
    """
    k = pl.program_id(2)

    @pl.when(k == 0)
    def _():
        acc_ref[...] = jnp.zeros_like(acc_ref)

    acc_ref[...] += jnp.dot(x_ref[...], w_ref[...],
                            preferred_element_type=jnp.float32)

    @pl.when(k == pl.num_programs(2) - 1)
    def _():
        y = acc_ref[...] + b_ref[...]
        if apply_act:
            y = jnp.where(y > 0, y, NEG_SLOPE * y)
        o_ref[...] = y.astype(o_ref.dtype)


def stacked_linear(x, w, b, *, act=True, out_dtype=jnp.bfloat16,
                   concat_views=False):
    """Per-view linear:  y[v] = lrelu(x[v] @ w[v] + b[v]).

    x: (V, M, K)   w: (V, K, N)   b: (V, N)   with N a multiple of 128.
    concat_views=False -> out (V, Mp, N)
    concat_views=True  -> out (Mp, V*N): view v is written into lane block v,
        i.e. the torch.cat([...], dim=1) buffer is produced directly by the
        out_spec (no separate concatenate copy).
    Mp/Kp are M/K rounded up to the tile sizes; callers slice rows back to M.
    """
    V, M, K = x.shape
    Vw, Kw, N = w.shape
    assert V == Vw and K == Kw and N % LANE == 0

    tm, Mp = _choose_tile(M, TM_MAX, SUBLANE)
    tk, Kp = _choose_tile(K, TK_MAX, LANE)

    x = x.astype(jnp.bfloat16)
    w = w.astype(jnp.bfloat16)
    if (Mp, Kp) != (M, K):
        x = jnp.pad(x, ((0, 0), (0, Mp - M), (0, Kp - K)))
    if Kp != K:
        w = jnp.pad(w, ((0, 0), (0, Kp - K), (0, 0)))
    b = b.reshape(V, 1, N).astype(jnp.float32)

    grid = (V, Mp // tm, Kp // tk)
    in_specs = [
        pl.BlockSpec((None, tm, tk), lambda v, i, k: (v, i, k)),
        pl.BlockSpec((None, tk, N), lambda v, i, k: (v, k, 0)),
        pl.BlockSpec((None, 1, N), lambda v, i, k: (v, 0, 0)),
    ]
    if concat_views:
        out_shape = jax.ShapeDtypeStruct((Mp, V * N), out_dtype)
        out_specs = pl.BlockSpec((tm, N), lambda v, i, k: (i, v))
    else:
        out_shape = jax.ShapeDtypeStruct((V, Mp, N), out_dtype)
        out_specs = pl.BlockSpec((None, tm, N), lambda v, i, k: (v, i, 0))

    return pl.pallas_call(
        functools.partial(_stacked_linear_kernel, apply_act=act),
        out_shape=out_shape,
        grid=grid,
        in_specs=in_specs,
        out_specs=out_specs,
        scratch_shapes=[pltpu.VMEM((tm, N), jnp.float32)],
        compiler_params=pltpu.CompilerParams(
            dimension_semantics=("parallel", "parallel", "arbitrary"),
            vmem_limit_bytes=VMEM_LIMIT),
    )(x, w, b)


def _classifier_kernel(x_ref, w1, b1, w2, b2, w3, b3, w4, b4, o_ref):
    """Fused 4-layer MLP + LeakyReLU + Softmax(dim=1); bf16 MXU, f32 accum."""

    def lrelu(v):
        return jnp.where(v > 0, v, NEG_SLOPE * v)

    def layer(h, w_ref, b_ref):
        return jnp.dot(h, w_ref[...],
                       preferred_element_type=jnp.float32) + b_ref[...]

    h = lrelu(layer(x_ref[...], w1, b1)).astype(jnp.bfloat16)
    h = lrelu(layer(h, w2, b2)).astype(jnp.bfloat16)
    h = lrelu(layer(h, w3, b3)).astype(jnp.bfloat16)
    logits = layer(h, w4, b4)            # padded class columns carry -1e30 bias
    m = jnp.max(logits, axis=-1, keepdims=True)
    e = jnp.exp(logits - m)
    denom = jnp.sum(e, axis=-1, keepdims=True)
    # TODO(synk): pl.reciprocal(denom, approx=True) would move this onto the
    # EUP on TPU; kept as an exact divide for interpret-mode portability.
    o_ref[...] = (e / denom).astype(o_ref.dtype)


def classifier_forward(x, cls_params):
    """x: (Bp, Din) with Din a multiple of 128; cls_params: 4 padded (w, b)."""
    Bp, din = x.shape
    tb, Bpp = _choose_tile(Bp, 256, SUBLANE)
    x = x.astype(jnp.bfloat16)
    if Bpp != Bp:
        x = jnp.pad(x, ((0, Bpp - Bp), (0, 0)))

    args = [x]
    in_specs = [pl.BlockSpec((tb, din), lambda i: (i, 0))]
    for w, b in cls_params:
        args += [w.astype(jnp.bfloat16), b.reshape(1, -1).astype(jnp.float32)]
        in_specs += [pl.BlockSpec(w.shape, lambda i: (0, 0)),
                     pl.BlockSpec((1, b.shape[0]), lambda i: (0, 0))]
    n_out = cls_params[-1][0].shape[1]

    return pl.pallas_call(
        _classifier_kernel,
        out_shape=jax.ShapeDtypeStruct((Bpp, n_out), jnp.float32),
        grid=(Bpp // tb,),
        in_specs=in_specs,
        out_specs=pl.BlockSpec((tb, n_out), lambda i: (i, 0)),
        compiler_params=pltpu.CompilerParams(
            dimension_semantics=("parallel",),
            vmem_limit_bytes=VMEM_LIMIT),
    )(*args)


# ----------------------------------------------------------------------------
# Plain-JAX glue: NHWC im2col (static stride!), conv compute is the Pallas matmul
# ----------------------------------------------------------------------------
def _im2col_3x3_nhwc(x, stride):
    """x: (V, B, H, W, C), k=3, pad=1 -> ((V, B*Ho*Wo, 9*C), Ho, Wo)."""
    V, B, H, W, C = x.shape
    Ho = (H + 2 - 3) // stride + 1
    Wo = (W + 2 - 3) // stride + 1
    xp = jnp.pad(x, ((0, 0), (0, 0), (1, 1), (1, 1), (0, 0)))
    cols = []
    for kh in range(3):
        for kw in range(3):
            sl = xp[:, :, kh:kh + stride * (Ho - 1) + 1:stride,
                          kw:kw + stride * (Wo - 1) + 1:stride, :]
            cols.append(sl)                               # (V, B, Ho, Wo, C)
    patches = jnp.stack(cols, axis=4)                     # (V, B, Ho, Wo, 9, C)
    return patches.reshape(V, B * Ho * Wo, 9 * C), Ho, Wo


# ----------------------------------------------------------------------------
# Parameter init (torch-default-like uniform(-1/sqrt(fan_in), +...)), converted
# once into the padded NHWC matmul layouts used by the kernels.
# ----------------------------------------------------------------------------
def _uniform(key, shape, fan_in):
    bound = 1.0 / math.sqrt(fan_in)
    return jax.random.uniform(key, shape, jnp.float32, -bound, bound)


def _conv_w_to_mat(w, cin_pad, cout_pad):
    """torch (Cout, Cin, 3, 3) -> (9*cin_pad, cout_pad), matching NHWC patches."""
    cout, cin = w.shape[0], w.shape[1]
    wt = jnp.transpose(w, (2, 3, 1, 0)).reshape(9, cin, cout)   # (k, cin, cout)
    wt = jnp.pad(wt, ((0, 0), (0, cin_pad - cin), (0, cout_pad - cout)))
    return wt.reshape(9 * cin_pad, cout_pad)


def _fc_w_to_mat(w, c, h, ww, c_pad, fc_pad):
    """torch (fc, C*H*W) (NCHW flatten) -> (H*W*c_pad, fc_pad) (NHWC flatten)."""
    fc = w.shape[0]
    wt = w.reshape(fc, c, h, ww)
    wt = jnp.transpose(wt, (2, 3, 1, 0))                        # (H, W, C, fc)
    wt = jnp.pad(wt, ((0, 0), (0, 0), (0, c_pad - c), (0, fc_pad - fc)))
    return wt.reshape(h * ww * c_pad, fc_pad)


def init_params(key, in_dims, out_classes, channels, strides, fc_size):
    c0, h0, w0 = in_dims
    assert channels[0] == c0, "channels[0] must equal the input channel count"
    n_layers = len(strides)
    assert len(channels) == n_layers + 1
    n_views = 4

    keys = iter(jax.random.split(key, n_views * (n_layers + 1) + 4))

    hs, ws = [h0], [w0]
    for s in strides:
        hs.append((hs[-1] + 2 - 3) // s + 1)
        ws.append((ws[-1] + 2 - 3) // s + 1)

    fc_pad = _ceil_to(fc_size, LANE)

    # Conv stack (per-view weights stacked along a leading view axis).
    conv_params = []
    for i in range(n_layers):
        cin, cout = channels[i], channels[i + 1]
        cin_eff = cin if i == 0 else _ceil_to(cin, LANE)   # activations carry padded C
        cout_pad = _ceil_to(cout, LANE)
        fan_in = cin * 9
        wmats, biases = [], []
        for _ in range(n_views):
            kw_, kb_ = jax.random.split(next(keys))
            w_t = _uniform(kw_, (cout, cin, 3, 3), fan_in)
            b_t = _uniform(kb_, (cout,), fan_in)
            wmats.append(_conv_w_to_mat(w_t, cin_eff, cout_pad))
            biases.append(jnp.pad(b_t, (0, cout_pad - cout)))
        conv_params.append((jnp.stack(wmats).astype(jnp.bfloat16),
                            jnp.stack(biases)))

    # Per-view FC: Linear(C_last*H*W -> fc_size) on the NCHW flatten; rows are
    # permuted/padded here so the runtime flatten can stay NHWC with padded C.
    c_last = channels[-1]
    c_last_pad = _ceil_to(c_last, LANE)
    flat = c_last * hs[-1] * ws[-1]
    fw, fb = [], []
    for _ in range(n_views):
        kw_, kb_ = jax.random.split(next(keys))
        w_t = _uniform(kw_, (fc_size, flat), flat)
        b_t = _uniform(kb_, (fc_size,), flat)
        fw.append(_fc_w_to_mat(w_t, c_last, hs[-1], ws[-1], c_last_pad, fc_pad))
        fb.append(jnp.pad(b_t, (0, fc_pad - fc_size)))
    fc_param = (jnp.stack(fw).astype(jnp.bfloat16), jnp.stack(fb))

    # Classifier: 4*fc -> fc -> fc -> fc//2 -> out_classes, lane dims padded.
    dims = [4 * fc_size, fc_size, fc_size, fc_size // 2, out_classes]
    in_pads = [4 * fc_pad, fc_pad, fc_pad, _ceil_to(fc_size // 2, LANE)]
    out_pads = [fc_pad, fc_pad, _ceil_to(fc_size // 2, LANE),
                _ceil_to(out_classes, LANE)]
    cls_params = []
    for li in range(4):
        kw_, kb_ = jax.random.split(next(keys))
        din, dout = dims[li], dims[li + 1]
        w_t = _uniform(kw_, (dout, din), din)             # torch Linear: (out, in)
        b_t = _uniform(kb_, (dout,), din)
        if li == 0:
            # torch.cat order is [view0 fc | view1 fc | ...]; re-lay each view's
            # rows into its fc_pad-wide block of the concatenated feature buffer.
            wt = w_t.T.reshape(4, fc_size, dout)
            wt = jnp.pad(wt, ((0, 0), (0, fc_pad - fc_size),
                              (0, out_pads[0] - dout)))
            wmat = wt.reshape(4 * fc_pad, out_pads[0])
        else:
            wmat = jnp.pad(w_t.T, ((0, in_pads[li] - din),
                                   (0, out_pads[li] - dout)))
        pad_val = -1e30 if li == 3 else 0.0               # padded class logits -> 0 prob
        bias = jnp.pad(b_t, (0, out_pads[li] - dout), constant_values=pad_val)
        cls_params.append((wmat.astype(jnp.bfloat16), bias))

    return {"conv": conv_params, "fc": fc_param, "cls": cls_params}


# ----------------------------------------------------------------------------
# Full model forward (strides / out_classes are STATIC, bound via partial)
# ----------------------------------------------------------------------------
def model_forward(params, l_cc, l_mlo, r_cc, r_mlo, *, strides, out_classes):
    """Inputs are NCHW (B, C, H, W) like the PyTorch module."""
    x = jnp.stack([l_cc, l_mlo, r_cc, r_mlo], axis=0)     # (4, B, C, H, W)
    x = jnp.transpose(x, (0, 1, 3, 4, 2))                 # NHWC: (4, B, H, W, C)
    B = x.shape[1]

    # Per-view conv stack: all 4 views share one pallas_call per layer.
    for (wmat, bias), s in zip(params["conv"], strides):
        V, Bn, H, W, C = x.shape
        patches, Ho, Wo = _im2col_3x3_nhwc(x, s)
        y = stacked_linear(patches, wmat, bias, act=True,
                           out_dtype=jnp.bfloat16)
        cout_p = wmat.shape[-1]
        x = y[:, :Bn * Ho * Wo, :].reshape(V, Bn, Ho, Wo, cout_p)

    # Per-view FC; writes directly into the concatenated classifier input.
    V, Bn, H, W, C = x.shape
    fc_w, fc_b = params["fc"]
    feats = stacked_linear(x.reshape(V, Bn, H * W * C), fc_w, fc_b, act=True,
                           out_dtype=jnp.bfloat16, concat_views=True)
    # feats: (Bpad, 4*fc_pad) == torch.cat([...], dim=1) with batch padded to 8.

    probs = classifier_forward(feats, params["cls"])      # (Bpad, out_pad)
    return probs[:B, :out_classes]


if __name__ == "__main__":
    # Small, self-consistent demo config.
    batch = 2
    in_dims = (1, 16, 16)          # (C, H, W) -> NCHW inputs (batch, 1, 16, 16)
    channels = [1, 8, 16]          # conv channel progression (incl. input)
    strides = [2, 2]               # spatial 16 -> 8 -> 4
    fc_size = 64
    out_classes = 3

    key = jax.random.PRNGKey(0)
    kp, k1, k2, k3, k4 = jax.random.split(key, 5)
    params = init_params(kp, in_dims, out_classes, channels, strides, fc_size)

    shape = (batch,) + in_dims
    l_cc = jax.random.normal(k1, shape, jnp.float32)
    l_mlo = jax.random.normal(k2, shape, jnp.float32)
    r_cc = jax.random.normal(k3, shape, jnp.float32)
    r_mlo = jax.random.normal(k4, shape, jnp.float32)

    fwd = jax.jit(functools.partial(model_forward,
                                    strides=tuple(strides),
                                    out_classes=out_classes))
    out = jax.block_until_ready(fwd(params, l_cc, l_mlo, r_cc, r_mlo))

    assert out.shape == (batch, out_classes)
    assert bool(jnp.all(jnp.isfinite(out)))
    # softmax rows sum to ~1 (f32 normalization; matmuls are bf16)
    assert jnp.allclose(jnp.sum(out, axis=1), 1.0, atol=1e-3)
    print("KERNEL_OK")
</pallas_src>

<mosaic_0001>
module attributes {stable_mosaic.version = 11 : i64} {
  func.func @_stacked_linear_kernel(%arg0: i32, %arg1: i32, %arg2: i32, %arg3: memref<1x128x128xbf16, #tpu.memory_space<vmem>>, %arg4: memref<1x128x128xbf16, #tpu.memory_space<vmem>>, %arg5: memref<1x1x128xf32, #tpu.memory_space<vmem>>, %arg6: memref<1x128x128xbf16, #tpu.memory_space<vmem>>, %arg7: memref<128x128xf32, #tpu.memory_space<vmem>>) attributes {dimension_semantics = [#tpu.dimension_semantics<parallel>, #tpu.dimension_semantics<parallel>, #tpu.dimension_semantics<arbitrary>], iteration_bounds = array<i64: 4, 1, 1>, scalar_prefetch = 0 : i64, scratch_operands = 1 : i64, tpu.core_type = #tpu.core_type<tc>, window_params = [{transform_indices = @transform_0, window_bounds = array<i64: 1, 128, 128>}, {transform_indices = @transform_1, window_bounds = array<i64: 1, 128, 128>}, {transform_indices = @transform_2, window_bounds = array<i64: 1, 1, 128>}, {transform_indices = @transform_3, window_bounds = array<i64: 1, 128, 128>}]} {
    %c0_i32 = arith.constant 0 : i32
    %0 = arith.cmpi eq, %arg2, %c0_i32 : i32
    %1 = arith.extui %0 : i1 to i32
    %c0_i32_0 = arith.constant 0 : i32
    %2 = arith.cmpi ne, %1, %c0_i32_0 : i32
    scf.if %2 {
      %cst_12 = arith.constant 0.000000e+00 : f32
      %14 = vector.broadcast %cst_12 : f32 to vector<128x128xf32>
      %c0_13 = arith.constant 0 : index
      %c0_14 = arith.constant 0 : index
      %15 = vector.load %arg7[%c0_13, %c0_14] : memref<128x128xf32, #tpu.memory_space<vmem>>, vector<128x128xf32>
      tpu.vector_store %arg7[%c0_13, %c0_14], %14 {strides = array<i32>} : memref<128x128xf32, #tpu.memory_space<vmem>>, vector<128x128xf32>,
    } else {
    }
    %c0 = arith.constant 0 : index
    %c0_1 = arith.constant 0 : index
    %3 = vector.load %arg7[%c0, %c0_1] : memref<128x128xf32, #tpu.memory_space<vmem>>, vector<128x128xf32>
    %c0_2 = arith.constant 0 : index
    %c0_3 = arith.constant 0 : index
    %c0_4 = arith.constant 0 : index
    %4 = vector.load %arg3[%c0_2, %c0_3, %c0_4] : memref<1x128x128xbf16, #tpu.memory_space<vmem>>, vector<1x128x128xbf16>
    %5 = vector.shape_cast %4 : vector<1x128x128xbf16> to vector<128x128xbf16>
    %c0_5 = arith.constant 0 : index
    %c0_6 = arith.constant 0 : index
    %c0_7 = arith.constant 0 : index
    %6 = vector.load %arg4[%c0_5, %c0_6, %c0_7] : memref<1x128x128xbf16, #tpu.memory_space<vmem>>, vector<1x128x128xbf16>
    %7 = vector.shape_cast %6 : vector<1x128x128xbf16> to vector<128x128xbf16>
    %cst = arith.constant dense<0.000000e+00> : vector<128x128xf32>
    %8 = tpu.matmul %5, %7, %cst {dimension_numbers = #tpu.dot_dimension_numbers<[1], [0], [0], [1], [0, 0, 1, 1], [], []>} : vector<128x128xbf16>, vector<128x128xbf16>, vector<128x128xf32> -> vector<128x128xf32>
    %9 = arith.addf %3, %8 : vector<128x128xf32>
    %c0_8 = arith.constant 0 : index
    %c0_9 = arith.constant 0 : index
    %10 = vector.load %arg7[%c0_8, %c0_9] : memref<128x128xf32, #tpu.memory_space<vmem>>, vector<128x128xf32>
    tpu.vector_store %arg7[%c0_8, %c0_9], %9 {strides = array<i32>} : memref<128x128xf32, #tpu.memory_space<vmem>>, vector<128x128xf32>,
    %c0_i32_10 = arith.constant 0 : i32
    %11 = arith.cmpi eq, %arg2, %c0_i32_10 : i32
    %12 = arith.extui %11 : i1 to i32
    %c0_i32_11 = arith.constant 0 : i32
    %13 = arith.cmpi ne, %12, %c0_i32_11 : i32
    scf.if %13 {
      %c0_12 = arith.constant 0 : index
      %c0_13 = arith.constant 0 : index
      %14 = vector.load %arg7[%c0_12, %c0_13] : memref<128x128xf32, #tpu.memory_space<vmem>>, vector<128x128xf32>
      %c0_14 = arith.constant 0 : index
      %c0_15 = arith.constant 0 : index
      %c0_16 = arith.constant 0 : index
      %15 = vector.load %arg5[%c0_14, %c0_15, %c0_16] : memref<1x1x128xf32, #tpu.memory_space<vmem>>, vector<1x1x128xf32>
      %16 = vector.shape_cast %15 : vector<1x1x128xf32> to vector<1x128xf32>
      %17 = vector.broadcast %16 : vector<1x128xf32> to vector<128x128xf32>
      %18 = arith.addf %14, %17 : vector<128x128xf32>
      %cst_17 = arith.constant 0.000000e+00 : f32
      %19 = vector.broadcast %cst_17 : f32 to vector<128x128xf32>
      %20 = arith.cmpf ogt, %18, %19 : vector<128x128xf32>
      %cst_18 = arith.constant 0.00999999977 : f32
      %21 = vector.broadcast %cst_18 : f32 to vector<128x128xf32>
      %22 = arith.mulf %21, %18 : vector<128x128xf32>
      %23 = arith.select %20, %18, %22 : vector<128x128xi1>, vector<128x128xf32>
      %24 = arith.truncf %23 : vector<128x128xf32> to vector<128x128xbf16>
      %c0_19 = arith.constant 0 : index
      %c0_20 = arith.constant 0 : index
      %c0_21 = arith.constant 0 : index
      %25 = vector.load %arg6[%c0_19, %c0_20, %c0_21] : memref<1x128x128xbf16, #tpu.memory_space<vmem>>, vector<1x128x128xbf16>
      %26 = vector.shape_cast %25 : vector<1x128x128xbf16> to vector<128x128xbf16>
      %27 = vector.shape_cast %24 : vector<128x128xbf16> to vector<1x128x128xbf16>
      tpu.vector_store %arg6[%c0_19, %c0_20, %c0_21], %27 {strides = array<i32>} : memref<1x128x128xbf16, #tpu.memory_space<vmem>>, vector<1x128x128xbf16>,
    } else {
    }
    return
  }
  func.func @transform_0(%arg0: i32, %arg1: i32, %arg2: i32) -> (i32, i32, i32) {
    %c0_i32 = arith.constant 0 : i32
    return %arg0, %arg1, %arg2 : i32, i32, i32
  }
  func.func @transform_1(%arg0: i32, %arg1: i32, %arg2: i32) -> (i32, i32, i32) {
    %c0_i32 = arith.constant 0 : i32
    %c0_i32_0 = arith.constant 0 : i32
    return %arg0, %arg2, %c0_i32 : i32, i32, i32
  }
  func.func @transform_2(%arg0: i32, %arg1: i32, %arg2: i32) -> (i32, i32, i32) {
    %c0_i32 = arith.constant 0 : i32
    %c0_i32_0 = arith.constant 0 : i32
    %c0_i32_1 = arith.constant 0 : i32
    return %arg0, %c0_i32, %c0_i32_0 : i32, i32, i32
  }
  func.func @transform_3(%arg0: i32, %arg1: i32, %arg2: i32) -> (i32, i32, i32) {
    %c0_i32 = arith.constant 0 : i32
    %c0_i32_0 = arith.constant 0 : i32
    return %arg0, %arg1, %c0_i32 : i32, i32, i32
  }
}

module attributes {stable_mosaic.version = 11 : i64} {
  func.func @_stacked_linear_kernel(%arg0: i32, %arg1: i32, %arg2: i32, %arg3: memref<1x32x384xbf16, #tpu.memory_space<vmem>>, %arg4: memref<1x384x128xbf16, #tpu.memory_space<vmem>>, %arg5: memref<1x1x128xf32, #tpu.memory_space<vmem>>, %arg6: memref<1x32x128xbf16, #tpu.memory_space<vmem>>, %arg7: memref<32x128xf32, #tpu.memory_space<vmem>>) attributes {dimension_semantics = [#tpu.dimension_semantics<parallel>, #tpu.dimension_semantics<parallel>, #tpu.dimension_semantics<arbitrary>], iteration_bounds = array<i64: 4, 1, 3>, scalar_prefetch = 0 : i64, scratch_operands = 1 : i64, tpu.core_type = #tpu.core_type<tc>, window_params = [{transform_indices = @transform_0, window_bounds = array<i64: 1, 32, 384>}, {transform_indices = @transform_1, window_bounds = array<i64: 1, 384, 128>}, {transform_indices = @transform_2, window_bounds = array<i64: 1, 1, 128>}, {transform_indices = @transform_3, window_bounds = array<i64: 1, 32, 128>}]} {
    %c0_i32 = arith.constant 0 : i32
    %0 = arith.cmpi eq, %arg2, %c0_i32 : i32
    %1 = arith.extui %0 : i1 to i32
    %c0_i32_0 = arith.constant 0 : i32
    %2 = arith.cmpi ne, %1, %c0_i32_0 : i32
    scf.if %2 {
      %cst_11 = arith.constant 0.000000e+00 : f32
      %14 = vector.broadcast %cst_11 : f32 to vector<32x128xf32>
      %c0_12 = arith.constant 0 : index
      %c0_13 = arith.constant 0 : index
      %15 = vector.load %arg7[%c0_12, %c0_13] : memref<32x128xf32, #tpu.memory_space<vmem>>, vector<32x128xf32>
      tpu.vector_store %arg7[%c0_12, %c0_13], %14 {strides = array<i32>} : memref<32x128xf32, #tpu.memory_space<vmem>>, vector<32x128xf32>,
    } else {
    }
    %c0 = arith.constant 0 : index
    %c0_1 = arith.constant 0 : index
    %3 = vector.load %arg7[%c0, %c0_1] : memref<32x128xf32, #tpu.memory_space<vmem>>, vector<32x128xf32>
    %c0_2 = arith.constant 0 : index
    %c0_3 = arith.constant 0 : index
    %c0_4 = arith.constant 0 : index
    %4 = vector.load %arg3[%c0_2, %c0_3, %c0_4] : memref<1x32x384xbf16, #tpu.memory_space<vmem>>, vector<1x32x384xbf16>
    %5 = vector.shape_cast %4 : vector<1x32x384xbf16> to vector<32x384xbf16>
    %c0_5 = arith.constant 0 : index
    %c0_6 = arith.constant 0 : index
    %c0_7 = arith.constant 0 : index
    %6 = vector.load %arg4[%c0_5, %c0_6, %c0_7] : memref<1x384x128xbf16, #tpu.memory_space<vmem>>, vector<1x384x128xbf16>
    %7 = vector.shape_cast %6 : vector<1x384x128xbf16> to vector<384x128xbf16>
    %cst = arith.constant dense<0.000000e+00> : vector<32x128xf32>
    %8 = tpu.matmul %5, %7, %cst {dimension_numbers = #tpu.dot_dimension_numbers<[1], [0], [0], [1], [0, 0, 1, 1], [], []>} : vector<32x384xbf16>, vector<384x128xbf16>, vector<32x128xf32> -> vector<32x128xf32>
    %9 = arith.addf %3, %8 : vector<32x128xf32>
    %c0_8 = arith.constant 0 : index
    %c0_9 = arith.constant 0 : index
    %10 = vector.load %arg7[%c0_8, %c0_9] : memref<32x128xf32, #tpu.memory_space<vmem>>, vector<32x128xf32>
    tpu.vector_store %arg7[%c0_8, %c0_9], %9 {strides = array<i32>} : memref<32x128xf32, #tpu.memory_space<vmem>>, vector<32x128xf32>,
    %c2_i32 = arith.constant 2 : i32
    %11 = arith.cmpi eq, %arg2, %c2_i32 : i32
    %12 = arith.extui %11 : i1 to i32
    %c0_i32_10 = arith.constant 0 : i32
    %13 = arith.cmpi ne, %12, %c0_i32_10 : i32
    scf.if %13 {
      %c0_11 = arith.constant 0 : index
      %c0_12 = arith.constant 0 : index
      %14 = vector.load %arg7[%c0_11, %c0_12] : memref<32x128xf32, #tpu.memory_space<vmem>>, vector<32x128xf32>
      %c0_13 = arith.constant 0 : index
      %c0_14 = arith.constant 0 : index
      %c0_15 = arith.constant 0 : index
      %15 = vector.load %arg5[%c0_13, %c0_14, %c0_15] : memref<1x1x128xf32, #tpu.memory_space<vmem>>, vector<1x1x128xf32>
      %16 = vector.shape_cast %15 : vector<1x1x128xf32> to vector<1x128xf32>
      %17 = vector.broadcast %16 : vector<1x128xf32> to vector<32x128xf32>
      %18 = arith.addf %14, %17 : vector<32x128xf32>
      %cst_16 = arith.constant 0.000000e+00 : f32
      %19 = vector.broadcast %cst_16 : f32 to vector<32x128xf32>
      %20 = arith.cmpf ogt, %18, %19 : vector<32x128xf32>
      %cst_17 = arith.constant 0.00999999977 : f32
      %21 = vector.broadcast %cst_17 : f32 to vector<32x128xf32>
      %22 = arith.mulf %21, %18 : vector<32x128xf32>
      %23 = arith.select %20, %18, %22 : vector<32x128xi1>, vector<32x128xf32>
      %24 = arith.truncf %23 : vector<32x128xf32> to vector<32x128xbf16>
      %c0_18 = arith.constant 0 : index
      %c0_19 = arith.constant 0 : index
      %c0_20 = arith.constant 0 : index
      %25 = vector.load %arg6[%c0_18, %c0_19, %c0_20] : memref<1x32x128xbf16, #tpu.memory_space<vmem>>, vector<1x32x128xbf16>
      %26 = vector.shape_cast %25 : vector<1x32x128xbf16> to vector<32x128xbf16>
      %27 = vector.shape_cast %24 : vector<32x128xbf16> to vector<1x32x128xbf16>
      tpu.vector_store %arg6[%c0_18, %c0_19, %c0_20], %27 {strides = array<i32>} : memref<1x32x128xbf16, #tpu.memory_space<vmem>>, vector<1x32x128xbf16>,
    } else {
    }
    return
  }
  func.func @transform_0(%arg0: i32, %arg1: i32, %arg2: i32) -> (i32, i32, i32) {
    %c0_i32 = arith.constant 0 : i32
    return %arg0, %arg1, %arg2 : i32, i32, i32
  }
  func.func @transform_1(%arg0: i32, %arg1: i32, %arg2: i32) -> (i32, i32, i32) {
    %c0_i32 = arith.constant 0 : i32
    %c0_i32_0 = arith.constant 0 : i32
    return %arg0, %arg2, %c0_i32 : i32, i32, i32
  }
  func.func @transform_2(%arg0: i32, %arg1: i32, %arg2: i32) -> (i32, i32, i32) {
    %c0_i32 = arith.constant 0 : i32
    %c0_i32_0 = arith.constant 0 : i32
    %c0_i32_1 = arith.constant 0 : i32
    return %arg0, %c0_i32, %c0_i32_0 : i32, i32, i32
  }
  func.func @transform_3(%arg0: i32, %arg1: i32, %arg2: i32) -> (i32, i32, i32) {
    %c0_i32 = arith.constant 0 : i32
    %c0_i32_0 = arith.constant 0 : i32
    return %arg0, %arg1, %c0_i32 : i32, i32, i32
  }
}

module attributes {stable_mosaic.version = 11 : i64} {
  func.func @_stacked_linear_kernel(%arg0: i32, %arg1: i32, %arg2: i32, %arg3: memref<1x8x512xbf16, #tpu.memory_space<vmem>>, %arg4: memref<1x512x128xbf16, #tpu.memory_space<vmem>>, %arg5: memref<1x1x128xf32, #tpu.memory_space<vmem>>, %arg6: memref<8x128xbf16, #tpu.memory_space<vmem>>, %arg7: memref<8x128xf32, #tpu.memory_space<vmem>>) attributes {dimension_semantics = [#tpu.dimension_semantics<parallel>, #tpu.dimension_semantics<parallel>, #tpu.dimension_semantics<arbitrary>], iteration_bounds = array<i64: 4, 1, 4>, scalar_prefetch = 0 : i64, scratch_operands = 1 : i64, tpu.core_type = #tpu.core_type<tc>, window_params = [{transform_indices = @transform_0, window_bounds = array<i64: 1, 8, 512>}, {transform_indices = @transform_1, window_bounds = array<i64: 1, 512, 128>}, {transform_indices = @transform_2, window_bounds = array<i64: 1, 1, 128>}, {transform_indices = @transform_3, window_bounds = array<i64: 8, 128>}]} {
    %c0_i32 = arith.constant 0 : i32
    %0 = arith.cmpi eq, %arg2, %c0_i32 : i32
    %1 = arith.extui %0 : i1 to i32
    %c0_i32_0 = arith.constant 0 : i32
    %2 = arith.cmpi ne, %1, %c0_i32_0 : i32
    scf.if %2 {
      %cst_11 = arith.constant 0.000000e+00 : f32
      %14 = vector.broadcast %cst_11 : f32 to vector<8x128xf32>
      %c0_12 = arith.constant 0 : index
      %c0_13 = arith.constant 0 : index
      %15 = vector.load %arg7[%c0_12, %c0_13] : memref<8x128xf32, #tpu.memory_space<vmem>>, vector<8x128xf32>
      tpu.vector_store %arg7[%c0_12, %c0_13], %14 {strides = array<i32>} : memref<8x128xf32, #tpu.memory_space<vmem>>, vector<8x128xf32>,
    } else {
    }
    %c0 = arith.constant 0 : index
    %c0_1 = arith.constant 0 : index
    %3 = vector.load %arg7[%c0, %c0_1] : memref<8x128xf32, #tpu.memory_space<vmem>>, vector<8x128xf32>
    %c0_2 = arith.constant 0 : index
    %c0_3 = arith.constant 0 : index
    %c0_4 = arith.constant 0 : index
    %4 = vector.load %arg3[%c0_2, %c0_3, %c0_4] : memref<1x8x512xbf16, #tpu.memory_space<vmem>>, vector<1x8x512xbf16>
    %5 = vector.shape_cast %4 : vector<1x8x512xbf16> to vector<8x512xbf16>
    %c0_5 = arith.constant 0 : index
    %c0_6 = arith.constant 0 : index
    %c0_7 = arith.constant 0 : index
    %6 = vector.load %arg4[%c0_5, %c0_6, %c0_7] : memref<1x512x128xbf16, #tpu.memory_space<vmem>>, vector<1x512x128xbf16>
    %7 = vector.shape_cast %6 : vector<1x512x128xbf16> to vector<512x128xbf16>
    %cst = arith.constant dense<0.000000e+00> : vector<8x128xf32>
    %8 = tpu.matmul %5, %7, %cst {dimension_numbers = #tpu.dot_dimension_numbers<[1], [0], [0], [1], [0, 0, 1, 1], [], []>} : vector<8x512xbf16>, vector<512x128xbf16>, vector<8x128xf32> -> vector<8x128xf32>
    %9 = arith.addf %3, %8 : vector<8x128xf32>
    %c0_8 = arith.constant 0 : index
    %c0_9 = arith.constant 0 : index
    %10 = vector.load %arg7[%c0_8, %c0_9] : memref<8x128xf32, #tpu.memory_space<vmem>>, vector<8x128xf32>
    tpu.vector_store %arg7[%c0_8, %c0_9], %9 {strides = array<i32>} : memref<8x128xf32, #tpu.memory_space<vmem>>, vector<8x128xf32>,
    %c3_i32 = arith.constant 3 : i32
    %11 = arith.cmpi eq, %arg2, %c3_i32 : i32
    %12 = arith.extui %11 : i1 to i32
    %c0_i32_10 = arith.constant 0 : i32
    %13 = arith.cmpi ne, %12, %c0_i32_10 : i32
    scf.if %13 {
      %c0_11 = arith.constant 0 : index
      %c0_12 = arith.constant 0 : index
      %14 = vector.load %arg7[%c0_11, %c0_12] : memref<8x128xf32, #tpu.memory_space<vmem>>, vector<8x128xf32>
      %c0_13 = arith.constant 0 : index
      %c0_14 = arith.constant 0 : index
      %c0_15 = arith.constant 0 : index
      %15 = vector.load %arg5[%c0_13, %c0_14, %c0_15] : memref<1x1x128xf32, #tpu.memory_space<vmem>>, vector<1x1x128xf32>
      %16 = vector.shape_cast %15 : vector<1x1x128xf32> to vector<1x128xf32>
      %17 = vector.broadcast %16 : vector<1x128xf32> to vector<8x128xf32>
      %18 = arith.addf %14, %17 : vector<8x128xf32>
      %cst_16 = arith.constant 0.000000e+00 : f32
      %19 = vector.broadcast %cst_16 : f32 to vector<8x128xf32>
      %20 = arith.cmpf ogt, %18, %19 : vector<8x128xf32>
      %cst_17 = arith.constant 0.00999999977 : f32
      %21 = vector.broadcast %cst_17 : f32 to vector<8x128xf32>
      %22 = arith.mulf %21, %18 : vector<8x128xf32>
      %23 = arith.select %20, %18, %22 : vector<8x128xi1>, vector<8x128xf32>
      %24 = arith.truncf %23 : vector<8x128xf32> to vector<8x128xbf16>
      %c0_18 = arith.constant 0 : index
      %c0_19 = arith.constant 0 : index
      %25 = vector.load %arg6[%c0_18, %c0_19] : memref<8x128xbf16, #tpu.memory_space<vmem>>, vector<8x128xbf16>
      tpu.vector_store %arg6[%c0_18, %c0_19], %24 {strides = array<i32>} : memref<8x128xbf16, #tpu.memory_space<vmem>>, vector<8x128xbf16>,
    } else {
    }
    return
  }
  func.func @transform_0(%arg0: i32, %arg1: i32, %arg2: i32) -> (i32, i32, i32) {
    %c0_i32 = arith.constant 0 : i32
    return %arg0, %arg1, %arg2 : i32, i32, i32
  }
  func.func @transform_1(%arg0: i32, %arg1: i32, %arg2: i32) -> (i32, i32, i32) {
    %c0_i32 = arith.constant 0 : i32
    %c0_i32_0 = arith.constant 0 : i32
    return %arg0, %arg2, %c0_i32 : i32, i32, i32
  }
  func.func @transform_2(%arg0: i32, %arg1: i32, %arg2: i32) -> (i32, i32, i32) {
    %c0_i32 = arith.constant 0 : i32
    %c0_i32_0 = arith.constant 0 : i32
    %c0_i32_1 = arith.constant 0 : i32
    return %arg0, %c0_i32, %c0_i32_0 : i32, i32, i32
  }
  func.func @transform_3(%arg0: i32, %arg1: i32, %arg2: i32) -> (i32, i32) {
    %c0_i32 = arith.constant 0 : i32
    return %arg1, %arg0 : i32, i32
  }
}

module attributes {stable_mosaic.version = 11 : i64} {
  func.func @_classifier_kernel(%arg0: i32, %arg1: memref<8x512xbf16, #tpu.memory_space<vmem>>, %arg2: memref<512x128xbf16, #tpu.memory_space<vmem>>, %arg3: memref<1x128xf32, #tpu.memory_space<vmem>>, %arg4: memref<128x128xbf16, #tpu.memory_space<vmem>>, %arg5: memref<1x128xf32, #tpu.memory_space<vmem>>, %arg6: memref<128x128xbf16, #tpu.memory_space<vmem>>, %arg7: memref<1x128xf32, #tpu.memory_space<vmem>>, %arg8: memref<128x128xbf16, #tpu.memory_space<vmem>>, %arg9: memref<1x128xf32, #tpu.memory_space<vmem>>, %arg10: memref<8x128xf32, #tpu.memory_space<vmem>>) attributes {dimension_semantics = [#tpu.dimension_semantics<parallel>], iteration_bounds = array<i64: 1>, scalar_prefetch = 0 : i64, scratch_operands = 0 : i64, tpu.core_type = #tpu.core_type<tc>, window_params = [{transform_indices = @transform_0, window_bounds = array<i64: 8, 512>}, {pipeline_mode = #tpu.pipeline_mode<synchronous>, transform_indices = @transform_1, window_bounds = array<i64: 512, 128>}, {pipeline_mode = #tpu.pipeline_mode<synchronous>, transform_indices = @transform_2, window_bounds = array<i64: 1, 128>}, {pipeline_mode = #tpu.pipeline_mode<synchronous>, transform_indices = @transform_3, window_bounds = array<i64: 128, 128>}, {pipeline_mode = #tpu.pipeline_mode<synchronous>, transform_indices = @transform_4, window_bounds = array<i64: 1, 128>}, {pipeline_mode = #tpu.pipeline_mode<synchronous>, transform_indices = @transform_5, window_bounds = array<i64: 128, 128>}, {pipeline_mode = #tpu.pipeline_mode<synchronous>, transform_indices = @transform_6, window_bounds = array<i64: 1, 128>}, {pipeline_mode = #tpu.pipeline_mode<synchronous>, transform_indices = @transform_7, window_bounds = array<i64: 128, 128>}, {pipeline_mode = #tpu.pipeline_mode<synchronous>, transform_indices = @transform_8, window_bounds = array<i64: 1, 128>}, {transform_indices = @transform_9, window_bounds = array<i64: 8, 128>}]} {
    %c0 = arith.constant 0 : index
    %c0_0 = arith.constant 0 : index
    %0 = vector.load %arg1[%c0, %c0_0] : memref<8x512xbf16, #tpu.memory_space<vmem>>, vector<8x512xbf16>
    %c0_1 = arith.constant 0 : index
    %c0_2 = arith.constant 0 : index
    %1 = vector.load %arg2[%c0_1, %c0_2] : memref<512x128xbf16, #tpu.memory_space<vmem>>, vector<512x128xbf16>
    %cst = arith.constant dense<0.000000e+00> : vector<8x128xf32>
    %2 = tpu.matmul %0, %1, %cst {dimension_numbers = #tpu.dot_dimension_numbers<[1], [0], [0], [1], [0, 0, 1, 1], [], []>} : vector<8x512xbf16>, vector<512x128xbf16>, vector<8x128xf32> -> vector<8x128xf32>
    %c0_3 = arith.constant 0 : index
    %c0_4 = arith.constant 0 : index
    %3 = vector.load %arg3[%c0_3, %c0_4] : memref<1x128xf32, #tpu.memory_space<vmem>>, vector<1x128xf32>
    %4 = vector.broadcast %3 : vector<1x128xf32> to vector<8x128xf32>
    %5 = arith.addf %2, %4 : vector<8x128xf32>
    %cst_5 = arith.constant 0.000000e+00 : f32
    %6 = vector.broadcast %cst_5 : f32 to vector<8x128xf32>
    %7 = arith.cmpf ogt, %5, %6 : vector<8x128xf32>
    %cst_6 = arith.constant 0.00999999977 : f32
    %8 = vector.broadcast %cst_6 : f32 to vector<8x128xf32>
    %9 = arith.mulf %8, %5 : vector<8x128xf32>
    %10 = arith.select %7, %5, %9 : vector<8x128xi1>, vector<8x128xf32>
    %11 = arith.truncf %10 : vector<8x128xf32> to vector<8x128xbf16>
    %c0_7 = arith.constant 0 : index
    %c0_8 = arith.constant 0 : index
    %12 = vector.load %arg4[%c0_7, %c0_8] : memref<128x128xbf16, #tpu.memory_space<vmem>>, vector<128x128xbf16>
    %cst_9 = arith.constant dense<0.000000e+00> : vector<8x128xf32>
    %13 = tpu.matmul %11, %12, %cst_9 {dimension_numbers = #tpu.dot_dimension_numbers<[1], [0], [0], [1], [0, 0, 1, 1], [], []>} : vector<8x128xbf16>, vector<128x128xbf16>, vector<8x128xf32> -> vector<8x128xf32>
    %c0_10 = arith.constant 0 : index
    %c0_11 = arith.constant 0 : index
    %14 = vector.load %arg5[%c0_10, %c0_11] : memref<1x128xf32, #tpu.memory_space<vmem>>, vector<1x128xf32>
    %15 = vector.broadcast %14 : vector<1x128xf32> to vector<8x128xf32>
    %16 = arith.addf %13, %15 : vector<8x128xf32>
    %cst_12 = arith.constant 0.000000e+00 : f32
    %17 = vector.broadcast %cst_12 : f32 to vector<8x128xf32>
    %18 = arith.cmpf ogt, %16, %17 : vector<8x128xf32>
    %cst_13 = arith.constant 0.00999999977 : f32
    %19 = vector.broadcast %cst_13 : f32 to vector<8x128xf32>
    %20 = arith.mulf %19, %16 : vector<8x128xf32>
    %21 = arith.select %18, %16, %20 : vector<8x128xi1>, vector<8x128xf32>
    %22 = arith.truncf %21 : vector<8x128xf32> to vector<8x128xbf16>
    %c0_14 = arith.constant 0 : index
    %c0_15 = arith.constant 0 : index
    %23 = vector.load %arg6[%c0_14, %c0_15] : memref<128x128xbf16, #tpu.memory_space<vmem>>, vector<128x128xbf16>
    %cst_16 = arith.constant dense<0.000000e+00> : vector<8x128xf32>
    %24 = tpu.matmul %22, %23, %cst_16 {dimension_numbers = #tpu.dot_dimension_numbers<[1], [0], [0], [1], [0, 0, 1, 1], [], []>} : vector<8x128xbf16>, vector<128x128xbf16>, vector<8x128xf32> -> vector<8x128xf32>
    %c0_17 = arith.constant 0 : index
    %c0_18 = arith.constant 0 : index
    %25 = vector.load %arg7[%c0_17, %c0_18] : memref<1x128xf32, #tpu.memory_space<vmem>>, vector<1x128xf32>
    %26 = vector.broadcast %25 : vector<1x128xf32> to vector<8x128xf32>
    %27 = arith.addf %24, %26 : vector<8x128xf32>
    %cst_19 = arith.constant 0.000000e+00 : f32
    %28 = vector.broadcast %cst_19 : f32 to vector<8x128xf32>
    %29 = arith.cmpf ogt, %27, %28 : vector<8x128xf32>
    %cst_20 = arith.constant 0.00999999977 : f32
    %30 = vector.broadcast %cst_20 : f32 to vector<8x128xf32>
    %31 = arith.mulf %30, %27 : vector<8x128xf32>
    %32 = arith.select %29, %27, %31 : vector<8x128xi1>, vector<8x128xf32>
    %33 = arith.truncf %32 : vector<8x128xf32> to vector<8x128xbf16>
    %c0_21 = arith.constant 0 : index
    %c0_22 = arith.constant 0 : index
    %34 = vector.load %arg8[%c0_21, %c0_22] : memref<128x128xbf16, #tpu.memory_space<vmem>>, vector<128x128xbf16>
    %cst_23 = arith.constant dense<0.000000e+00> : vector<8x128xf32>
    %35 = tpu.matmul %33, %34, %cst_23 {dimension_numbers = #tpu.dot_dimension_numbers<[1], [0], [0], [1], [0, 0, 1, 1], [], []>} : vector<8x128xbf16>, vector<128x128xbf16>, vector<8x128xf32> -> vector<8x128xf32>
    %c0_24 = arith.constant 0 : index
    %c0_25 = arith.constant 0 : index
    %36 = vector.load %arg9[%c0_24, %c0_25] : memref<1x128xf32, #tpu.memory_space<vmem>>, vector<1x128xf32>
    %37 = vector.broadcast %36 : vector<1x128xf32> to vector<8x128xf32>
    %38 = arith.addf %35, %37 : vector<8x128xf32>
    %cst_26 = arith.constant dense<0xFF800000> : vector<8xf32>
    %39 = vector.multi_reduction <maximumf>, %38, %cst_26 [1] : vector<8x128xf32> to vector<8xf32>
    %40 = vector.shape_cast %39 : vector<8xf32> to vector<8x1xf32>
    %41 = vector.broadcast %40 : vector<8x1xf32> to vector<8x128xf32>
    %42 = arith.subf %38, %41 : vector<8x128xf32>
    %43 = math.exp %42 : vector<8x128xf32>
    %cst_27 = arith.constant dense<0.000000e+00> : vector<8xf32>
    %44 = vector.multi_reduction <add>, %43, %cst_27 [1] : vector<8x128xf32> to vector<8xf32>
    %45 = vector.shape_cast %44 : vector<8xf32> to vector<8x1xf32>
    %46 = vector.broadcast %45 : vector<8x1xf32> to vector<8x128xf32>
    %47 = arith.divf %43, %46 : vector<8x128xf32>
    %c0_28 = arith.constant 0 : index
    %c0_29 = arith.constant 0 : index
    %48 = vector.load %arg10[%c0_28, %c0_29] : memref<8x128xf32, #tpu.memory_space<vmem>>, vector<8x128xf32>
    tpu.vector_store %arg10[%c0_28, %c0_29], %47 {strides = array<i32>} : memref<8x128xf32, #tpu.memory_space<vmem>>, vector<8x128xf32>,
    return
  }
  func.func @transform_0(%arg0: i32) -> (i32, i32) {
    %c0_i32 = arith.constant 0 : i32
    %c0_i32_0 = arith.constant 0 : i32
    return %arg0, %c0_i32 : i32, i32
  }
  func.func @transform_1(%arg0: i32) -> (i32, i32) {
    %c0_i32 = arith.constant 0 : i32
    %c0_i32_0 = arith.constant 0 : i32
    %c0_i32_1 = arith.constant 0 : i32
    return %c0_i32, %c0_i32_0 : i32, i32
  }
  func.func @transform_2(%arg0: i32) -> (i32, i32) {
    %c0_i32 = arith.constant 0 : i32
    %c0_i32_0 = arith.constant 0 : i32
    %c0_i32_1 = arith.constant 0 : i32
    return %c0_i32, %c0_i32_0 : i32, i32
  }
  func.func @transform_3(%arg0: i32) -> (i32, i32) {
    %c0_i32 = arith.constant 0 : i32
    %c0_i32_0 = arith.constant 0 : i32
    %c0_i32_1 = arith.constant 0 : i32
    return %c0_i32, %c0_i32_0 : i32, i32
  }
  func.func @transform_4(%arg0: i32) -> (i32, i32) {
    %c0_i32 = arith.constant 0 : i32
    %c0_i32_0 = arith.constant 0 : i32
    %c0_i32_1 = arith.constant 0 : i32
    return %c0_i32, %c0_i32_0 : i32, i32
  }
  func.func @transform_5(%arg0: i32) -> (i32, i32) {
    %c0_i32 = arith.constant 0 : i32
    %c0_i32_0 = arith.constant 0 : i32
    %c0_i32_1 = arith.constant 0 : i32
    return %c0_i32, %c0_i32_0 : i32, i32
  }
  func.func @transform_6(%arg0: i32) -> (i32, i32) {
    %c0_i32 = arith.constant 0 : i32
    %c0_i32_0 = arith.constant 0 : i32
    %c0_i32_1 = arith.constant 0 : i32
    return %c0_i32, %c0_i32_0 : i32, i32
  }
  func.func @transform_7(%arg0: i32) -> (i32, i32) {
    %c0_i32 = arith.constant 0 : i32
    %c0_i32_0 = arith.constant 0 : i32
    %c0_i32_1 = arith.constant 0 : i32
    return %c0_i32, %c0_i32_0 : i32, i32
  }
  func.func @transform_8(%arg0: i32) -> (i32, i32) {
    %c0_i32 = arith.constant 0 : i32
    %c0_i32_0 = arith.constant 0 : i32
    %c0_i32_1 = arith.constant 0 : i32
    return %c0_i32, %c0_i32_0 : i32, i32
  }
  func.func @transform_9(%arg0: i32) -> (i32, i32) {
    %c0_i32 = arith.constant 0 : i32
    %c0_i32_0 = arith.constant 0 : i32
    return %arg0, %c0_i32 : i32, i32
  }
}

</mosaic_0001>

<bundles_post_ra>
// kernel: model_forward.4
= control target key start
LH: loop header
LB: loop body
LE: loop exit
PB: predicated region body
PF: predicated region fallthrough
CT: control target
= control target key end

     0   :  { %8 = vsyncpa [#allocation4], 0  ;;  %s1410_s0 = inlined_call_operand.vmem [shape: bf16[4,128,128], index: 0, kind: input, shape index: {}]   ;;  %s1411_s1 = inlined_call_operand.vmem [shape: bf16[4,128,128], index: 1, kind: input, shape index: {}]   ;;  %s1412_s2 = inlined_call_operand.hbm [shape: f32[4,1,128], index: 2, kind: input, shape index: {}]   ;;  %s1413_s3 = inlined_call_operand.vmem [shape: bf16[4,128,128], index: 3, kind: output, shape index: {}]  }
   0x1   :  { %10 = vsyncpa [#allocation4 + $0x1], 0  ;;  %s1242_s12 = smov 0   ;;  %s1244_s13 = smov 0  }
   0x2   :  { %s1246_s14 = smov 0   ;;  %s1248_s15 = smov 0  }
   0x3   :  { %s1250_s16 = smov 0   ;;  %s1252_s17 = smov 0  }
   0x4 LB: > { %s893_s18 = sadd.s32 4294967295, %s1219_s17   ;;  %s35_s19 = sadd.s32 1, %s1215_s16  ;;  %s1219_s17 = sphi %s1252_s17, %s16_s17   ;;  %s1215_s16 = sphi %s1250_s16, %s1421_s16   ;;  %s1211_s15 = sphi %s1248_s15, %s1420_s15   ;;  %s1207_s14 = sphi %s1246_s14, %s1419_s14   ;;  %s1203_s13 = sphi %s1244_s13, %s1418_s13   ;;  %s1199_s12 = sphi %s1242_s12, %s1417_s12  }
   0x5   : > { %p37_p0 = scmp.ge.s32.totalorder %s35_s19, 4  ;;  %s100_s20 = sadd.s32 1, %s1207_s14 }
   0x6   : > { %p107_p1 = scmp.ne.s32.totalorder %s1207_s14, %s1203_s13  ;;  %p108_p2 = scmp.eq.s32.totalorder %s1219_s17, 0 }
   0x7   : > { %s1423_s19 = smov (%p37_p0, %s35_s19), 0  ;;  %p113_p4 = scmp.ne.s32.totalorder %s1203_s13, %s1199_s12 }
   0x8   : > { %p1278_p3 = por %p108_p2, %p107_p1  ;;  %s97_s22 = ssub.s32 %s1215_s16, %s1423_s19 }
   0x9   : > { %p114_p5 = scmp.eq.s32.totalorder %s893_s18, 0  ;;  %p98_p6 = scmp.eq.s32.totalorder %s97_s22, 0 }
   0xa   : > { %p1076_p8 = scmp.lt.s32.totalorder %s1219_s17, 4  ;;  %s194_s25 = sand.u32 1, %s1207_s14  }
   0xb   : > { %p1285_p7 = por %p114_p5, %p113_p4  ;;  %s897_s26 = sshll.u32 %s1215_s16, 4 }
   0xc   : > { %s1291_s24 = scalar_select %p98_p6, %s1207_s14, %s100_s20  }
   0xd   : > { %s202_s29 = scalar_lea.hbm %s1412_s2, %s897_s26  ;;  %s197_s30 = scalar_lea.vmem [#allocation3], %s194_s25 }
   0xe   : > { %s204_s4 = sshll.u32 %s197_s30, 4  ;;  %p1300_p9 = pnand %p1076_p8, %p1278_p3  ;;  %s205_s4 = int_to_ptr.vmem [resolvable:$true] %s204_s4 }
   0xf   : > { %p898_p10 = scmp.ge.s32.totalorder %s1219_s17, 1  ;;  %p209_p11 = scmp.lt.s32.totalorder %s1219_s17, 5 }
  0x10   : > { %s195_s6 = scalar_lea.sflag [#allocation4], %s194_s25  ;;  %p1143_p12 = pneg %p1300_p9 }
  0x11   : > { %s1154_s7 = scalar_lea.vmem %s205_s4, 16  ;;  %s1221_s8 = smov [#allocation3]  }
  0x12   : > { %p1155_p13 = scmp.ne.s32.totalorder %s205_s4, %s1154_s7  ;;  %s1159_s9 = sshll.u32 %s1221_s8, 4  ;;  %s1160_s9 = int_to_ptr.vmem [resolvable:$false] %s1159_s9 }
  0x13   : > { %s1161_s10 = scalar_lea.vmem %s1160_s9, 32  ;;  %p1162_p2 = scmp.lt.s32.totalorder %s205_s4, %s1160_s9 }
  0x14   : > { %p1157_p0 = pnand %p1155_p13, %p1143_p12  ;;  %p1163_p4 = scmp.lt.s32.totalorder %s1161_s10, %s1154_s7 }
  0x16   : > { %p1158_p1 = pneg %p1157_p0  ;;  %p1164_p3 = por %p1163_p4, %p1162_p2 }
  0x18   : > { %p1165_p5 = pnand %p1164_p3, %p1158_p1 }
  0x1a   : > { %1168 = shalt.err (!%p1165_p5)
}
  0x1b   : > { %1075 = dma.hbm_to_vmem [thread:$0]  (!%p1300_p9), %s202_s29, 16, %s205_s4, %s195_s6  }
  0x1c   : > { %p210_p6 = pnand %p898_p10, %p209_p11 }
  0x1d   : > { %s215_s11 = sand.u32 (!%p210_p6), 1, %s1203_s13  }
  0x1e   : > { %213 = sbr.rel (%p210_p6) target bundleno = 290 (0x122), region = 32  ;;  %s216_s12 = scalar_lea.sflag (!%p210_p6), [#allocation4], %s215_s11 }
  0x1f   : > { %s1315_s18 = scalar_lea.vmem (!%p210_p6), [#allocation3], %s215_s11 }
  0x23   : > { %1194 = dma.done.wait (%p1285_p7), %s216_s12, 16  }
  0x24   : > { %1196 = vsyncadd (%p1285_p7), %s216_s12, 4294967280  ;;  %p266_p8 = scmp.lt.s32.totalorder %s1211_s15, 3  ;;  %v1354_v16 = vld [vmem:[%s1315_s18] ss:$0 sm:$0xff] }
  0x26   : > { %s1425_s15 = smov (!%p266_p8, %s1211_s15), 3 }
  0x27   : > { %s1323_s20 = sshll.u32 %s1425_s15, 6 }
  0x28   : > { %s1329_s25 = scalar_lea.vmem %s1411_s1, %s1323_s20  ;;  %s1338_s26 = scalar_lea.vmem %s1410_s0, %s1323_s20 }
  0x29   : > { %v1125_v0 = vld [vmem:[%s1329_s25 + $0x38] sm:$0xff]   ;;  %v1126_v1 = vld [vmem:[%s1329_s25 + $0x30] sm:$0xff]   ;;  %v1127_v2 = vld [vmem:[%s1329_s25 + $0x28] sm:$0xff]   ;;  %s1368_s29 = scalar_lea.vmem %s1413_s3, %s1323_s20 }
  0x2a   : > { %1022 = vmatprep.subr.bf16.mxu0 %v1125_v0  ;;  %1054 = vmatprep.subr.bf16.mxu1 %v1125_v0  ;;  %v1128_v3 = vld [vmem:[%s1329_s25 + $0x20] sm:$0xff]   ;;  %v1129_v6 = vld [vmem:[%s1329_s25 + $0x18] sm:$0xff]   ;;  %v1130_v7 = vld [vmem:[%s1329_s25 + $0x10] sm:$0xff]  }
  0x2b   : > { %1023 = vmatpush3.bf16.msra.mxu0 %v1125_v0  ;;  %1062 = vmatpush3.bf16.msra.mxu1 %v1125_v0  ;;  %v1133_v4 = vld [vmem:[%s1338_s26] sm:$0xff]   ;;  %v1131_v8 = vld [vmem:[%s1329_s25 + $0x8] sm:$0xff]   ;;  %v1137_v12 = vld [vmem:[%s1338_s26 + $0x10] sm:$0xff]  }
  0x2c   : > { %1024 = vmatprep.subr.bf16.mxu0 %v1126_v1  ;;  %1055 = vmatprep.subr.bf16.mxu1 %v1126_v1  ;;  %v1134_v5 = vld [vmem:[%s1338_s26 + $0x20] sm:$0xff]   ;;  %v1135_v10 = vld [vmem:[%s1338_s26 + $0x8] sm:$0xff]   ;;  %v1138_v13 = vld [vmem:[%s1338_s26 + $0x30] sm:$0xff]  }
  0x2d   : > { %1038 = vmatprep.mubr.bf16.mxu0 %v1133_v4  ;;  %1046 = vmatprep.mubr.bf16.mxu1 %v1134_v5  ;;  %v1132_v9 = vld [vmem:[%s1329_s25] sm:$0xff]   ;;  %v1136_v11 = vld [vmem:[%s1338_s26 + $0x28] sm:$0xff]   ;;  %v1139_v14 = vld [vmem:[%s1338_s26 + $0x18] sm:$0xff]  }
  0x2e   : > { %v1140_v15 = vld [vmem:[%s1338_s26 + $0x38] sm:$0xff]  }
  0x2f   : > { %1025 = vmatpush3.bf16.msra.mxu0 %v1126_v1  ;;  %1063 = vmatpush3.bf16.msra.mxu1 %v1126_v1 }
  0x30   : > { %1026 = vmatprep.subr.bf16.mxu0 %v1127_v2  ;;  %1056 = vmatprep.subr.bf16.mxu1 %v1127_v2 }
  0x33   : > { %1027 = vmatpush3.bf16.msra.mxu0 %v1127_v2  ;;  %1064 = vmatpush3.bf16.msra.mxu1 %v1127_v2 }
  0x34   : > { %1028 = vmatprep.subr.bf16.mxu0 %v1128_v3  ;;  %1057 = vmatprep.subr.bf16.mxu1 %v1128_v3 }
  0x37   : > { %1029 = vmatpush3.bf16.msra.mxu0 %v1128_v3  ;;  %1065 = vmatpush3.bf16.msra.mxu1 %v1128_v3 }
  0x38   : > { %1030 = vmatprep.subr.bf16.mxu0 %v1129_v6  ;;  %1058 = vmatprep.subr.bf16.mxu1 %v1129_v6 }
  0x3b   : > { %1031 = vmatpush3.bf16.msra.mxu0 %v1129_v6  ;;  %1066 = vmatpush3.bf16.msra.mxu1 %v1129_v6 }
  0x3c   : > { %1032 = vmatprep.subr.bf16.mxu0 %v1130_v7  ;;  %1059 = vmatprep.subr.bf16.mxu1 %v1130_v7 }
  0x3f   : > { %1033 = vmatpush3.bf16.msra.mxu0 %v1130_v7  ;;  %1067 = vmatpush3.bf16.msra.mxu1 %v1130_v7 }
  0x40   : > { %1034 = vmatprep.subr.bf16.mxu0 %v1131_v8  ;;  %1060 = vmatprep.subr.bf16.mxu1 %v1131_v8 }
  0x43   : > { %1035 = vmatpush3.bf16.msra.mxu0 %v1131_v8  ;;  %1068 = vmatpush3.bf16.msra.mxu1 %v1131_v8 }
  0x44   : > { %1036 = vmatprep.subr.bf16.mxu0 %v1132_v9  ;;  %1061 = vmatprep.subr.bf16.mxu1 %v1132_v9 }
  0x47   : > { %1037 = vmatpush3.bf16.msra.mxu0 %v1132_v9  ;;  %1069 = vmatpush3.bf16.msra.mxu1 %v1132_v9 }
  0x4a   : > { %1039 = vmatmul.mubr.bf16.vlgmr.msra.gmra.mxu0 %v1135_v10  ;;  %1047 = vmatmul.mubr.bf16.vlgmr.msra.gmra.mxu1 %v1136_v11 }
  0x4b   : > { %1042 = vmatprep.mubr.bf16.mxu0 %v1137_v12  ;;  %1050 = vmatprep.mubr.bf16.mxu1 %v1138_v13 }
  0x52   : > { %1043 = vmatmul.mubr.bf16.gmra.mxu0 %v1139_v14  ;;  %1051 = vmatmul.mubr.bf16.gmra.mxu1 %v1140_v15 }
 0x10a   : > { %v1040_v17 = vpop.f32.mrf.mxu0  ;;  %v1048_v18 = vpop.f32.mrf.mxu1 }
 0x10b   : > { %v620_v19 = vadd.f32 %v1040_v17, %v1354_v16  ;;  %v628_v20 = vadd.f32 %v1048_v18, %v1354_v16 }
 0x10c   : > { %v497_v21 = vpop.f32.mrf.mxu0  ;;  %v529_v22 = vpop.f32.mrf.mxu1 }
 0x10d   : > { %vm636_vm0 = vcmp.gt.f32.partialorder %v620_v19, 0.0  ;;  %v652_v23 = vmul.f32 0.01, %v620_v19  ;;  %vm644_vm1 = vcmp.gt.f32.partialorder %v628_v20, 0.0  ;;  %v660_v24 = vmul.f32 0.01, %v628_v20 }
 0x10e   : > { %v618_v25 = vadd.f32 %v1354_v16, %v497_v21  ;;  %v626_v26 = vadd.f32 %v1354_v16, %v529_v22  ;;  %v1041_v27 = vpop.f32.mrf.mxu0  ;;  %v1049_v28 = vpop.f32.mrf.mxu1 }
 0x10f   : > { %v621_v29 = vadd.f32 %v1041_v27, %v1354_v16  ;;  %v629_v30 = vadd.f32 %v1049_v28, %v1354_v16  ;;  %v668_v31 = vsel %vm636_vm0, %v620_v19, %v652_v23  ;;  %v676_v32 = vsel %vm644_vm1, %v628_v20, %v660_v24 }
 0x110   : > { %vm634_vm2 = vcmp.gt.f32.partialorder %v618_v25, 0.0  ;;  %v650_v33 = vmul.f32 0.01, %v618_v25  ;;  %v500_v34 = vpop.f32.mrf.mxu0  ;;  %v532_v35 = vpop.f32.mrf.mxu1  ;;  %vm642_vm5 = vcmp.gt.f32.partialorder %v626_v26, 0.0  ;;  %v658_v38 = vmul.f32 0.01, %v626_v26 }
 0x111   : > { %vm637_vm3 = vcmp.gt.f32.partialorder %v621_v29, 0.0  ;;  %v653_v36 = vmul.f32 0.01, %v621_v29  ;;  %vm645_vm4 = vcmp.gt.f32.partialorder %v629_v30, 0.0  ;;  %v661_v37 = vmul.f32 0.01, %v629_v30 }
 0x112   : > { %v619_v39 = vadd.f32 %v1354_v16, %v500_v34  ;;  %v627_v40 = vadd.f32 %v1354_v16, %v532_v35  ;;  %v1044_v41 = vpop.f32.mrf.mxu0  ;;  %v1052_v42 = vpop.f32.mrf.mxu1  ;;  %v666_v53 = vsel %vm634_vm2, %v618_v25, %v650_v33  ;;  %v674_v58 = vsel %vm642_vm5, %v626_v26, %v658_v38 }
 0x113   : > { %v669_v43 = vsel %vm637_vm3, %v621_v29, %v653_v36  ;;  %v677_v44 = vsel %vm645_vm4, %v629_v30, %v661_v37  ;;  %v624_v45 = vadd.f32 %v1044_v41, %v1354_v16  ;;  %v632_v46 = vadd.f32 %v1052_v42, %v1354_v16 }
 0x114   : > { %v967_v47 = vpack.c.bf16 %v669_v43, %v668_v31  ;;  %v987_v48 = vpack.c.bf16 %v677_v44, %v676_v32  ;;  %vm635_vm6 = vcmp.gt.f32.partialorder %v619_v39, 0.0  ;;  %v651_v49 = vmul.f32 0.01, %v619_v39  ;;  %v513_v50 = vpop.f32.mrf.mxu0  ;;  %v545_v51 = vpop.f32.mrf.mxu1 }
 0x115   : > { %vm643_vm7 = vcmp.gt.f32.partialorder %v627_v40, 0.0  ;;  %v659_v52 = vmul.f32 0.01, %v627_v40  ;;  %v622_v55 = vadd.f32 %v1354_v16, %v513_v50  ;;  %v630_v61 = vadd.f32 %v1354_v16, %v545_v51 }
 0x116   : > { %999 = vst [vmem:[%s1368_s29 + $0x8] sm:$0xff] %v967_v47   ;;  %1003 = vst [vmem:[%s1368_s29 + $0x28] sm:$0xff] %v987_v48   ;;  %v667_v54 = vsel %vm635_vm6, %v619_v39, %v651_v49  ;;  %v1045_v56 = vpop.f32.mrf.mxu0  ;;  %v1053_v57 = vpop.f32.mrf.mxu1  ;;  %vm640_vm8 = vcmp.gt.f32.partialorder %v624_v45, 0.0  ;;  %v656_v63 = vmul.f32 0.01, %v624_v45  ;;  %vm648_vm9 = vcmp.gt.f32.partialorder %v632_v46, 0.0 }
 0x117   : > { %v962_v59 = vpack.c.bf16 %v667_v54, %v666_v53  ;;  %v675_v60 = vsel %vm643_vm7, %v627_v40, %v659_v52  ;;  %v664_v2 = vmul.f32 0.01, %v632_v46  ;;  %vm638_vm10 = vcmp.gt.f32.partialorder %v622_v55, 0.0 }
 0x118   : > { %v982_v62 = vpack.c.bf16 %v675_v60, %v674_v58  ;;  %v516_v0 = vpop.f32.mrf.mxu0  ;;  %v548_v1 = vpop.f32.mrf.mxu1  ;;  %v625_v3 = vadd.f32 %v1045_v56, %v1354_v16  ;;  %v633_v4 = vadd.f32 %v1053_v57, %v1354_v16  ;;  %v654_v5 = vmul.f32 0.01, %v622_v55 }
 0x119   : > { %963 = vst [vmem:[%s1368_s29] sm:$0xff] %v962_v59   ;;  %vm646_vm11 = vcmp.gt.f32.partialorder %v630_v61, 0.0  ;;  %v623_v6 = vadd.f32 %v1354_v16, %v516_v0  ;;  %v631_v7 = vadd.f32 %v1354_v16, %v548_v1  ;;  %v662_v8 = vmul.f32 0.01, %v630_v61 }
 0x11a   : > { %1002 = vst [vmem:[%s1368_s29 + $0x20] sm:$0xff] %v982_v62   ;;  %vm641_vm12 = vcmp.gt.f32.partialorder %v625_v3, 0.0  ;;  %v657_v9 = vmul.f32 0.01, %v625_v3  ;;  %vm649_vm13 = vcmp.gt.f32.partialorder %v633_v4, 0.0  ;;  %v672_v12 = vsel %vm640_vm8, %v624_v45, %v656_v63 }
 0x11b   : > { %v665_v10 = vmul.f32 0.01, %v633_v4  ;;  %vm639_vm14 = vcmp.gt.f32.partialorder %v623_v6, 0.0  ;;  %v655_v11 = vmul.f32 0.01, %v623_v6  ;;  %vm647_vm15 = vcmp.gt.f32.partialorder %v631_v7, 0.0 }
 0x11c   : > { %v680_v13 = vsel %vm648_vm9, %v632_v46, %v664_v2  ;;  %v673_v14 = vsel %vm641_vm12, %v625_v3, %v657_v9  ;;  %v663_v15 = vmul.f32 0.01, %v631_v7  ;;  %v670_v16 = vsel %vm638_vm10, %v622_v55, %v654_v5 }
 0x11d   : > { %v977_v17 = vpack.c.bf16 %v673_v14, %v672_v12  ;;  %v681_v18 = vsel %vm649_vm13, %v633_v4, %v665_v10  ;;  %v671_v19 = vsel %vm639_vm14, %v623_v6, %v655_v11  ;;  %v678_v20 = vsel %vm646_vm11, %v630_v61, %v662_v8 }
 0x11e   : > { %v997_v21 = vpack.c.bf16 %v681_v18, %v680_v13  ;;  %v972_v22 = vpack.c.bf16 %v671_v19, %v670_v16  ;;  %v679_v23 = vsel %vm647_vm15, %v631_v7, %v663_v15 }
 0x11f   : > { %1001 = vst [vmem:[%s1368_s29 + $0x18] sm:$0xff] %v977_v17   ;;  %v992_v24 = vpack.c.bf16 %v679_v23, %v678_v20 }
 0x120   : > { %1005 = vst [vmem:[%s1368_s29 + $0x38] sm:$0xff] %v997_v21   ;;  %1000 = vst [vmem:[%s1368_s29 + $0x10] sm:$0xff] %v972_v22  }
 0x121   : > { %1004 = vst [vmem:[%s1368_s29 + $0x30] sm:$0xff] %v992_v24  }
 0x122 PF: > { %s16_s17 = sadd.s32 1, %s1219_s17   ;;  %s1417_s12 = smov %s1203_s13 }
 0x123   : > { %p13_p7 = scmp.ge.s32.totalorder %s16_s17, 6   ;;  %s1418_s13 = smov %s1207_s14 }
 0x124   : > { %s1419_s14 = smov %s1291_s24  ;;  %s1420_s15 = smov %s1215_s16 }
 0x125   : > { %s1421_s16 = smov %s1423_s19  ;;  %15 = sbr.rel (!%p13_p7) target bundleno = 4 (0x4), region = 86 }
 0x12a   :  { %792 = vsyncpa [#allocation4], 1 }
 0x12b   :  { %794 = vsyncpa [#allocation4 + $0x1], 1 }

// kernel: model_forward.5
= control target key start
LH: loop header
LB: loop body
LE: loop exit
PB: predicated region body
PF: predicated region fallthrough
CT: control target
= control target key end

     0   :  { %s1137_s12 = smov 0   ;;  %s1139_s13 = smov 0   ;;  %s1283_s0 = inlined_call_operand.vmem [shape: bf16[4,32,1152], index: 0, kind: input, shape index: {}]   ;;  %s1284_s1 = inlined_call_operand.vmem [shape: bf16[4,1152,128], index: 1, kind: input, shape index: {}]   ;;  %s1285_s2 = inlined_call_operand.vmem [shape: f32[4,1,128], index: 2, kind: input, shape index: {}]   ;;  %s1286_s3 = inlined_call_operand.vmem [shape: bf16[4,32,128], index: 3, kind: output, shape index: {}]  }
   0x1   :  { %s1141_s14 = smov 0   ;;  %s1143_s15 = smov 0  }
   0x2   :  { %s1145_s16 = smov 0   ;;  %s1147_s17 = smov 0  }
   0x3   :  { %s1149_s18 = smov 0  }
   0x4 LB: > { %s25_s19 = sadd.s32 1, %s1106_s16  ;;  %s32_s20 = sadd.s32 1, %s1110_s17  ;;  %s1114_s18 = sphi %s1149_s18, %s13_s18   ;;  %s1110_s17 = sphi %s1147_s17, %s1292_s17   ;;  %s1106_s16 = sphi %s1145_s16, %s1291_s16   ;;  %s1102_s15 = sphi %s1143_s15, %s1290_s15   ;;  %s1098_s14 = sphi %s1141_s14, %s1289_s14   ;;  %s1094_s13 = sphi %s1139_s13, %s1288_s13   ;;  %s1090_s12 = sphi %s1137_s12, %s1287_s12  }
   0x5   : > { %p26_p0 = scmp.ge.s32.totalorder %s25_s19, 3  ;;  %p50_p1 = scmp.ne.s32.totalorder %s1094_s13, %s1090_s12 }
   0x6   : > { %p51_p2 = scmp.eq.s32.totalorder %s1114_s18, 0  ;;  %s43_s24 = sadd.s32 1, %s1094_s13 }
   0x7   : > { %s1294_s19 = smov (%p26_p0, %s25_s19), 0  ;;  %s1296_s20 = smov (!%p26_p0, %s32_s20), %s1110_s17 }
   0x8   : > { %p52_p3 = por %p51_p2, %p50_p1  ;;  %p34_p4 = scmp.ge.s32.totalorder %s1296_s20, 4 }
   0x9   : > { %s39_s21 = ssub.s32 %s1106_s16, %s1294_s19  ;;  %p840_p6 = scmp.ge.s32.totalorder %s1114_s18, 12 }
   0xa   : > { %s1298_s20 = smov (%p34_p4, %s1296_s20), 0 }
   0xb   : > { %s36_s22 = ssub.s32 %s1110_s17, %s1298_s20  ;;  %158 = sbr.rel (%p840_p6) target bundleno = 29 (0x1d), region = 16 }
   0xc   : > { %s40_s23 = sor.u32 %s39_s21, %s36_s22 }
   0xd   : > { %p41_p5 = scmp.eq.s32.totalorder %s40_s23, 0 }
   0xf   : > { %s1188_s25 = scalar_select %p41_p5, %s1094_s13, %s43_s24  }
  0x10   : > { %161 = sbr.rel (!%p52_p3) target bundleno = 29 (0x1d), region = 20  ;;  %s163_s26 = sand.u32 (%p52_p3), 1, %s1094_s13  }
  0x11   : > { %s167_s27 = smul.u32 (%p52_p3), 3, %s1106_s16 }
  0x12   : > { %s967_s28 = smul.u32 (%p52_p3), 48, %s163_s26 }
  0x13   : > { %s968_s29 = smul.u32 (%p52_p3), 36, %s1110_s17 }
  0x14   : > { %s165_s8 = scalar_lea.vmem (%p52_p3), [#allocation3], %s967_s28 }
  0x15   : > { %s171_s30 = sadd.s32 %s968_s29, %s167_s27 }
  0x16   : > { %s841_s4 = sshll.u32 %s171_s30, 2 }
  0x17   : > { %s173_s7 = scalar_lea.vmem %s1283_s0, %s841_s4 }
  0x18   : > { %v188_v0 = vld [vmem:[%s173_s7] sm:$0xff]  ;;  %v192_v2 = vld [vmem:[%s173_s7 + $0x48] sm:$0xff]  ;;  %v846_v6 = vld [vmem:[%s173_s7 + $0x50] sm:$0xf] }
  0x19   : > { %v190_v1 = vld [vmem:[%s173_s7 + $0x24] sm:$0xff]  ;;  %189 = vst [vmem:[%s165_s8] sm:$0xff] %v188_v0  ;;  %193 = vst [vmem:[%s165_s8 + $0x18] sm:$0xff] %v192_v2  ;;  %v194_v3 = vld [vmem:[%s173_s7 + $0x6c] sm:$0xff] }
  0x1a   : > { %191 = vst [vmem:[%s165_s8 + $0xc] sm:$0xff] %v190_v1  ;;  %v842_v4 = vld [vmem:[%s173_s7 + $0x8] sm:$0xf]  ;;  %v844_v5 = vld [vmem:[%s173_s7 + $0x2c] sm:$0xf]  ;;  %195 = vst [vmem:[%s165_s8 + $0x24] sm:$0xff] %v194_v3 }
  0x1b   : > { %843 = vst [vmem:[%s165_s8 + $0x8] sm:$0xf] %v842_v4  ;;  %845 = vst [vmem:[%s165_s8 + $0x14] sm:$0xf] %v844_v5  ;;  %v848_v7 = vld [vmem:[%s173_s7 + $0x74] sm:$0xf] }
  0x1c   : > { %847 = vst [vmem:[%s165_s8 + $0x20] sm:$0xf] %v846_v6  ;;  %849 = vst [vmem:[%s165_s8 + $0x2c] sm:$0xf] %v848_v7 }
  0x1d PF: > { %p850_p7 = scmp.ge.s32.totalorder %s1114_s18, 1  ;;  %p235_p8 = scmp.lt.s32.totalorder %s1114_s18, 13 }
  0x1f   : > { %p236_p9 = pnand %p850_p7, %p235_p8 }
  0x20   : > { %s242_s9 = sand.u32 (!%p236_p9), 1, %s1090_s12   ;;  %s283_s10 = smul.u32 (!%p236_p9), 48, %s1098_s14 }
  0x21   : > { %239 = sbr.rel (%p236_p9) target bundleno = 310 (0x136), region = 54  ;;  %p284_p10 = scmp.lt.s32.totalorder (!%p236_p9), %s1102_s15, 3 }
  0x22   : > { %s969_s11 = smul.u32 (!%p236_p9), 48, %s242_s9  ;;  %p286_p11 = scmp.lt.s32.totalorder (!%p236_p9), %s283_s10, 143 }
  0x23   : > { %p854_p12 = scmp.ne.s32.totalorder (!%p236_p9), %s1098_s14, 0 }
  0x24   : > { %s1221_s7 = scalar_lea.vmem (!%p236_p9), [#allocation3], %s969_s11 }
  0x26   : > { %s1300_s15 = smov (!%p284_p10, %s1102_s15), 3  ;;  %s1302_s10 = smov (!%p286_p11, %s283_s10), 143 }
  0x27   : > { %s970_s21 = smul.u32 144, %s1300_s15  ;;  %s295_s24 = scalar_lea.vmem %s1285_s2, %s1300_s15 }
  0x28   : > { %s893_s26 = sshll.u32 %s1300_s15, 4  ;;  %310 = sbr.rel (%p854_p12) target bundleno = 48 (0x30), region = 62 }
  0x29   : > { %s289_s27 = sadd.s32 %s970_s21, %s1302_s10  ;;  %s1214_s12 = scalar_lea.vmem %s1286_s3, %s893_s26 }
  0x2a   : > { %s851_s30 = sshll.u32 %s289_s27, 2 }
  0x2b   : > { %s1219_s6 = scalar_lea.vmem %s1284_s1, %s851_s30 }
  0x2d   : > { %v1116_v8 = vmov 0.0  }
  0x2e   : > { %311 = vst [vmem:[#allocation2 + $0x10] sm:$0xff] %v1116_v8  ;;  %312 = vst [vmem:[#allocation2] sm:$0xff] %v1116_v8 }
  0x2f   : > { %313 = vst [vmem:[#allocation2 + $0x18] sm:$0xff] %v1116_v8  ;;  %314 = vst [vmem:[#allocation2 + $0x8] sm:$0xff] %v1116_v8 }
  0x30 PF: > { %v1028_v9 = vld [vmem:[%s1219_s6 + $0x78] sm:$0xff]   ;;  %v1031_v12 = vld [vmem:[%s1219_s6 + $0x70] sm:$0xff]   ;;  %v1034_v15 = vld [vmem:[%s1219_s6 + $0x68] sm:$0xff]   ;;  %p885_p13 = scmp.ne.s32.totalorder %s1098_s14, 2 }
  0x31   : > { %v1029_v10 = vld [vmem:[%s1219_s6 + $0x38] sm:$0xff]   ;;  %909 = vmatprep.subr.bf16.mxu0 %v1028_v9  ;;  %v1032_v13 = vld [vmem:[%s1219_s6 + $0x30] sm:$0xff]   ;;  %v1035_v16 = vld [vmem:[%s1219_s6 + $0x28] sm:$0xff]  }
  0x32   : > { %v1030_v11 = vld [vmem:[%s1219_s6 + $0xb8] sm:$0xff]   ;;  %910 = vmatpush3.bf16.msra.mxu0 %v1029_v10  ;;  %v1033_v14 = vld [vmem:[%s1219_s6 + $0xb0] sm:$0xff]   ;;  %v1036_v17 = vld [vmem:[%s1219_s6 + $0xa8] sm:$0xff]  }
  0x33   : > { %947 = vmatprep.subr.bf16.mxu1 %v1030_v11  ;;  %911 = vmatprep.subr.bf16.mxu0 %v1031_v12  ;;  %v1037_v18 = vld [vmem:[%s1219_s6 + $0x60] sm:$0xff]   ;;  %v1040_v21 = vld [vmem:[%s1219_s6 + $0x58] sm:$0xff]   ;;  %v1043_v24 = vld [vmem:[%s1219_s6 + $0x50] sm:$0xff]  }
  0x34   : > { %948 = vmatpush3.bf16.msra.mxu1 %v1030_v11  ;;  %v1038_v19 = vld [vmem:[%s1219_s6 + $0x20] sm:$0xff]   ;;  %v1042_v22 = vld [vmem:[%s1219_s6 + $0x98] sm:$0xff]   ;;  %v1045_v25 = vld [vmem:[%s1219_s6 + $0x90] sm:$0xff]  }
  0x35   : > { %949 = vmatprep.subr.bf16.mxu1 %v1033_v14  ;;  %v1039_v20 = vld [vmem:[%s1219_s6 + $0xa0] sm:$0xff]   ;;  %v1041_v23 = vld [vmem:[%s1219_s6 + $0x18] sm:$0xff]   ;;  %v1044_v26 = vld [vmem:[%s1219_s6 + $0x10] sm:$0xff]  }
  0x36   : > { %912 = vmatpush3.bf16.msra.mxu0 %v1032_v13  ;;  %v1046_v27 = vld [vmem:[%s1219_s6 + $0x48] sm:$0xff]   ;;  %v1049_v30 = vld [vmem:[%s1219_s6 + $0x40] sm:$0xff]   ;;  %v315_v44 = vld [vmem:[#allocation2 + $0x10] sm:$0xff] }
  0x37   : > { %913 = vmatprep.subr.bf16.mxu0 %v1034_v15  ;;  %v1047_v28 = vld [vmem:[%s1219_s6 + $0x8] sm:$0xff]   ;;  %v1051_v31 = vld [vmem:[%s1219_s6 + $0x80] sm:$0xff]   ;;  %v317_v58 = vld [vmem:[#allocation2 + $0x18] sm:$0xff] }
  0x38   : > { %950 = vmatpush3.bf16.msra.mxu1 %v1033_v14  ;;  %v1048_v29 = vld [vmem:[%s1219_s6 + $0x88] sm:$0xff]   ;;  %v1054_v32 = vld [vmem:[%s1221_s7 + $0x4] ss:$12 sps:$4 sm:$0xff]  }
  0x39   : > { %951 = vmatprep.subr.bf16.mxu1 %v1036_v17  ;;  %v1055_v33 = vld [vmem:[%s1221_s7 + $0x8] ss:$12 sps:$4 sm:$0xff]   ;;  %583 = vmatprep.mubr.bf16.mxu0 %v1054_v32  ;;  %v1052_v35 = vld [vmem:[%s1221_s7] ss:$12 sps:$4 sm:$0xff]   ;;  %v1059_v38 = vld [vmem:[%s1221_s7 + $0x18] ss:$12 sps:$4 sm:$0xff]  }
  0x3a   : > { %914 = vmatpush3.bf16.msra.mxu0 %v1035_v16  ;;  %v1050_v34 = vld [vmem:[%s1219_s6] sm:$0xff]   ;;  %963 = vmatprep.mubr.bf16.mxu1 %v1055_v33  ;;  %v1057_v36 = vld [vmem:[%s1221_s7 + $0x1c] ss:$12 sps:$4 sm:$0xff]  }
  0x3b   : > { %915 = vmatprep.subr.bf16.mxu0 %v1037_v18  ;;  %v1056_v37 = vld [vmem:[%s1221_s7 + $0x20] ss:$12 sps:$4 sm:$0xff]  }
  0x3c   : > { %952 = vmatpush3.bf16.msra.mxu1 %v1036_v17  ;;  %v316_v52 = vld [vmem:[#allocation2] sm:$0xff]  ;;  %v318_v0 = vld [vmem:[#allocation2 + $0x8] sm:$0xff] }
  0x3d   : > { %953 = vmatprep.subr.bf16.mxu1 %v1039_v20 }
  0x3e   : > { %916 = vmatpush3.bf16.msra.mxu0 %v1038_v19 }
  0x3f   : > { %917 = vmatprep.subr.bf16.mxu0 %v1040_v21 }
  0x40   : > { %954 = vmatpush3.bf16.msra.mxu1 %v1039_v20 }
  0x41   : > { %955 = vmatprep.subr.bf16.mxu1 %v1042_v22 }
  0x42   : > { %918 = vmatpush3.bf16.msra.mxu0 %v1041_v23 }
  0x43   : > { %919 = vmatprep.subr.bf16.mxu0 %v1043_v24 }
  0x44   : > { %956 = vmatpush3.bf16.msra.mxu1 %v1042_v22 }
  0x45   : > { %957 = vmatprep.subr.bf16.mxu1 %v1045_v25 }
  0x46   : > { %920 = vmatpush3.bf16.msra.mxu0 %v1044_v26 }
  0x47   : > { %921 = vmatprep.subr.bf16.mxu0 %v1046_v27 }
  0x48   : > { %958 = vmatpush3.bf16.msra.mxu1 %v1045_v25 }
  0x49   : > { %959 = vmatprep.subr.bf16.mxu1 %v1048_v29 }
  0x4a   : > { %922 = vmatpush3.bf16.msra.mxu0 %v1047_v28 }
  0x4b   : > { %923 = vmatprep.subr.bf16.mxu0 %v1049_v30 }
  0x4c   : > { %960 = vmatpush3.bf16.msra.mxu1 %v1048_v29 }
  0x4d   : > { %961 = vmatprep.subr.bf16.mxu1 %v1051_v31 }
  0x4e   : > { %924 = vmatpush3.bf16.msra.mxu0 %v1050_v34 }
  0x50   : > { %962 = vmatpush3.bf16.msra.mxu1 %v1051_v31 }
  0x51   : > { %584 = vmatmul.mubr.bf16.vlgmr.msra.gmra.mxu0 %v1052_v35 }
  0x52   : > { %591 = vmatprep.mubr.bf16.mxu0 %v1057_v36 }
  0x53   : > { %964 = vmatmul.mubr.bf16.vlgmr.msra.gmra.mxu1 %v1056_v37 }
  0x59   : > { %592 = vmatmul.mubr.bf16.gmra.mxu0 %v1059_v38 }
 0x111   : > { %v925_v39 = vpop.f32.mrf.mxu0 }
 0x113   : > { %v926_v40 = vpop.f32.mrf.mxu0  ;;  %v965_v41 = vpop.f32.mrf.mxu1 }
 0x114   : > { %v927_v42 = vadd.f32 %v926_v40, %v925_v39 }
 0x115   : > { %v928_v43 = vpop.f32.mrf.mxu0  ;;  %v634_v45 = vpop.f32.mrf.mxu1 }
 0x116   : > { %v635_v46 = vadd.f32 %v927_v42, %v634_v45 }
 0x117   : > { %v929_v47 = vpop.f32.mrf.mxu0  ;;  %v966_v48 = vpop.f32.mrf.mxu1 }
 0x118   : > { %v649_v49 = vadd.f32 %v635_v46, %v315_v44  ;;  %v930_v50 = vadd.f32 %v929_v47, %v928_v43 }
 0x119   : > { %v931_v51 = vpop.f32.mrf.mxu0  ;;  %v637_v53 = vpop.f32.mrf.mxu1 }
 0x11a   : > { %653 = vst [vmem:[#allocation2 + $0x10] sm:$0xff] %v649_v49  ;;  %v638_v54 = vadd.f32 %v930_v50, %v637_v53 }
 0x11b   : > { %v932_v55 = vpop.f32.mrf.mxu0 }
 0x11c   : > { %v650_v56 = vadd.f32 %v638_v54, %v316_v52  ;;  %v933_v57 = vadd.f32 %v932_v55, %v931_v51 }
 0x11d   : > { %v934_v59 = vpop.f32.mrf.mxu0 }
 0x11e   : > { %654 = vst [vmem:[#allocation2] sm:$0xff] %v650_v56  ;;  %v643_v60 = vadd.f32 %v965_v41, %v933_v57 }
 0x11f   : > { %v935_v61 = vpop.f32.mrf.mxu0 }
 0x120   : > { %v651_v62 = vadd.f32 %v643_v60, %v317_v58  ;;  %v936_v63 = vadd.f32 %v935_v61, %v934_v59 }
 0x122   : > { %655 = vst [vmem:[#allocation2 + $0x18] sm:$0xff] %v651_v62  ;;  %v646_v1 = vadd.f32 %v966_v48, %v936_v63  ;;  %660 = sbr.rel (%p885_p13) target bundleno = 310 (0x136), region = 66 }
 0x124   : > { %v652_v2 = vadd.f32 %v646_v1, %v318_v0 }
 0x126   : > { %656 = vst [vmem:[#allocation2 + $0x8] sm:$0xff] %v652_v2 }
 0x127   : > { %v661_v3 = vld [vmem:[#allocation2 + $0x10] sm:$0xff]  ;;  %v662_v4 = vld [vmem:[#allocation2] sm:$0xff] }
 0x128   : > { %v886_v5 = vld [vmem:[%s295_s24] ss:$0 sm:$0xff] }
 0x129   : > { %v672_v6 = vadd.f32 %v886_v5, %v661_v3  ;;  %v673_v7 = vadd.f32 %v886_v5, %v662_v4  ;;  %v663_v8 = vld [vmem:[#allocation2 + $0x18] sm:$0xff] }
 0x12a   : > { %v674_v10 = vadd.f32 %v886_v5, %v663_v8 }
 0x12b   : > { %vm676_vm0 = vcmp.gt.f32.partialorder %v672_v6, 0.0  ;;  %vm677_vm1 = vcmp.gt.f32.partialorder %v673_v7, 0.0  ;;  %v680_v12 = vmul.f32 0.01, %v672_v6  ;;  %v681_v13 = vmul.f32 0.01, %v673_v7 }
 0x12c   : > { %vm678_vm2 = vcmp.gt.f32.partialorder %v674_v10, 0.0  ;;  %v682_v14 = vmul.f32 0.01, %v674_v10 }
 0x12d   : > { %v664_v9 = vld [vmem:[#allocation2 + $0x8] sm:$0xff]  ;;  %v684_v16 = vsel %vm676_vm0, %v672_v6, %v680_v12  ;;  %v685_v17 = vsel %vm677_vm1, %v673_v7, %v681_v13 }
 0x12e   : > { %v675_v11 = vadd.f32 %v886_v5, %v664_v9  ;;  %v901_v18 = vpack.c.bf16 %v685_v17, %v684_v16  ;;  %v686_v19 = vsel %vm678_vm2, %v674_v10, %v682_v14 }
 0x130   : > { %vm679_vm3 = vcmp.gt.f32.partialorder %v675_v11, 0.0  ;;  %v683_v15 = vmul.f32 0.01, %v675_v11  ;;  %902 = vst [vmem:[%s1214_s12] sm:$0xff] %v901_v18  }
 0x132   : > { %v687_v20 = vsel %vm679_vm3, %v675_v11, %v683_v15 }
 0x133   : > { %v906_v21 = vpack.c.bf16 %v687_v20, %v686_v19 }
 0x135   : > { %908 = vst [vmem:[%s1214_s12 + $0x8] sm:$0xff] %v906_v21  }
 0x136 PF: > { %s13_s18 = sadd.s32 1, %s1114_s18   ;;  %s1287_s12 = smov %s1094_s13 }
 0x137   : > { %p10_p0 = scmp.ge.s32.totalorder %s13_s18, 14   ;;  %s1288_s13 = smov %s1188_s25 }
 0x138   : > { %s1289_s14 = smov %s1106_s16  ;;  %s1290_s15 = smov %s1110_s17 }
 0x139   : > { %s1291_s16 = smov %s1294_s19  ;;  %s1292_s17 = smov %s1298_s20 }
 0x13a   :  { %12 = sbr.rel (!%p10_p0) target bundleno = 4 (0x4), region = 113 }

// kernel: model_forward.6
= control target key start
LH: loop header
LB: loop body
LE: loop exit
PB: predicated region body
PF: predicated region fallthrough
CT: control target
= control target key end

     0   :  { %s1014_s12 = smov 0   ;;  %s1016_s13 = smov 0   ;;  %s1129_s0 = inlined_call_operand.vmem [shape: bf16[4,8,2048], index: 0, kind: input, shape index: {}]   ;;  %s1130_s1 = inlined_call_operand.vmem [shape: bf16[4,2048,128], index: 1, kind: input, shape index: {}]   ;;  %s1131_s2 = inlined_call_operand.vmem [shape: f32[4,1,128], index: 2, kind: input, shape index: {}]   ;;  %s1132_s3 = inlined_call_operand.vmem [shape: bf16[8,512], index: 3, kind: output, shape index: {}]  }
   0x1   :  { %s1018_s14 = smov 0   ;;  %s1020_s15 = smov 0  }
   0x2   :  { %s1022_s16 = smov 0  }
   0x3 LB: > { %s25_s17 = sadd.s32 1, %s983_s14  ;;  %s32_s18 = sadd.s32 1, %s987_s15  ;;  %s991_s16 = sphi %s1022_s16, %s13_s16   ;;  %s987_s15 = sphi %s1020_s15, %s1136_s15   ;;  %s983_s14 = sphi %s1018_s14, %s1135_s14   ;;  %s979_s13 = sphi %s1016_s13, %s1134_s13   ;;  %s975_s12 = sphi %s1014_s12, %s1133_s12  }
   0x4   : > { %p26_p0 = scmp.ge.s32.totalorder %s25_s17, 4  ;;  %p783_p1 = scmp.ge.s32.totalorder %s991_s16, 1 }
   0x5   : > { %p196_p2 = scmp.lt.s32.totalorder %s991_s16, 17 }
   0x6   : > { %s1138_s17 = smov (%p26_p0, %s25_s17), 0  ;;  %s1140_s18 = smov (!%p26_p0, %s32_s18), %s987_s15 }
   0x7   : > { %p197_p3 = pnand %p783_p1, %p196_p2  ;;  %p34_p4 = scmp.ge.s32.totalorder %s1140_s18, 4 }
   0x8   : > { %s784_s19 = sshll.u32 (!%p197_p3), %s975_s12, 2  ;;  %p244_p5 = scmp.lt.s32.totalorder (!%p197_p3), %s979_s13, 3 }
   0x9   : > { %s1142_s18 = smov (%p34_p4, %s1140_s18), 0  ;;  %200 = sbr.rel (%p197_p3) target bundleno = 279 (0x117), region = 32 }
   0xa   : > { %p248_p6 = scmp.lt.s32.totalorder (!%p197_p3), %s784_s19, 15  ;;  %s787_s20 = sshll.u32 (!%p197_p3), %s975_s12, 6 }
   0xb   : > { %p260_p7 = scmp.lt.s32.totalorder (!%p197_p3), %s787_s20, 255  ;;  %p791_p8 = scmp.ne.s32.totalorder (!%p197_p3), %s975_s12, 0 }
   0xe   : > { %s1144_s13 = smov (!%p244_p5, %s979_s13), 3  ;;  %s1146_s19 = smov (!%p248_p6, %s784_s19), 15 }
   0xf   : > { %s785_s21 = sshll.u32 %s1144_s13, 4  ;;  %s788_s23 = sshll.u32 %s1144_s13, 8 }
  0x10   : > { %s253_s22 = sadd.s32 %s785_s21, %s1146_s19  ;;  %s269_s27 = scalar_lea.vmem %s1131_s2, %s1144_s13 }
  0x11   : > { %s786_s24 = sshll.u32 %s253_s22, 2  ;;  %s790_s4 = sshll.u32 %s1144_s13, 2 }
  0x12   : > { %s1059_s30 = scalar_lea.vmem %s1129_s0, %s786_s24  ;;  %s1148_s20 = smov (!%p260_p7, %s787_s20), 255 }
  0x13   : > { %s1065_s7 = scalar_lea.vmem %s1132_s3, %s790_s4  ;;  %s263_s8 = sadd.s32 %s788_s23, %s1148_s20 }
  0x14   : > { %s789_s9 = sshll.u32 %s263_s8, 2  ;;  %282 = sbr.rel (%p791_p8) target bundleno = 27 (0x1b), region = 36 }
  0x15   : > { %s1070_s19 = scalar_lea.vmem %s1130_s1, %s789_s9 }
  0x19   : > { %v993_v0 = vmov 0.0  }
  0x1a   : > { %283 = vst [vmem:[#allocation2] sm:$0xff] %v993_v0 }
  0x1b PF: > { %v917_v1 = vld [vmem:[%s1070_s19 + $0x78] sm:$0xff]   ;;  %v921_v5 = vld [vmem:[%s1070_s19 + $0x70] sm:$0xff]   ;;  %v925_v9 = vld [vmem:[%s1070_s19 + $0x68] sm:$0xff]   ;;  %p828_p9 = scmp.ne.s32.totalorder %s975_s12, 3 }
  0x1c   : > { %v918_v2 = vld [vmem:[%s1070_s19 + $0xf8] sm:$0xff]   ;;  %832 = vmatprep.subr.bf16.mxu0 %v917_v1  ;;  %v922_v6 = vld [vmem:[%s1070_s19 + $0xf0] sm:$0xff]   ;;  %v926_v10 = vld [vmem:[%s1070_s19 + $0xe8] sm:$0xff]  }
  0x1d   : > { %v919_v3 = vld [vmem:[%s1070_s19 + $0x38] sm:$0xff]   ;;  %854 = vmatprep.subr.bf16.mxu1 %v918_v2  ;;  %v923_v7 = vld [vmem:[%s1070_s19 + $0x30] sm:$0xff]   ;;  %v927_v11 = vld [vmem:[%s1070_s19 + $0x28] sm:$0xff]  }
  0x1e   : > { %v920_v4 = vld [vmem:[%s1070_s19 + $0xb8] sm:$0xff]   ;;  %833 = vmatpush3.bf16.msra.mxu0 %v919_v3  ;;  %v924_v8 = vld [vmem:[%s1070_s19 + $0xb0] sm:$0xff]   ;;  %v928_v12 = vld [vmem:[%s1070_s19 + $0xa8] sm:$0xff]  }
  0x1f   : > { %855 = vmatpush3.bf16.msra.mxu1 %v920_v4  ;;  %834 = vmatprep.subr.bf16.mxu0 %v921_v5  ;;  %v929_v13 = vld [vmem:[%s1070_s19 + $0x60] sm:$0xff]   ;;  %v933_v17 = vld [vmem:[%s1070_s19 + $0x58] sm:$0xff]   ;;  %v937_v21 = vld [vmem:[%s1070_s19 + $0x50] sm:$0xff]  }
  0x20   : > { %856 = vmatprep.subr.bf16.mxu1 %v922_v6  ;;  %v930_v14 = vld [vmem:[%s1070_s19 + $0xe0] sm:$0xff]   ;;  %v934_v18 = vld [vmem:[%s1070_s19 + $0xd8] sm:$0xff]   ;;  %v938_v22 = vld [vmem:[%s1070_s19 + $0xd0] sm:$0xff]  }
  0x21   : > { %v931_v15 = vld [vmem:[%s1070_s19 + $0x20] sm:$0xff]   ;;  %v935_v19 = vld [vmem:[%s1070_s19 + $0x18] sm:$0xff]   ;;  %v939_v23 = vld [vmem:[%s1070_s19 + $0x10] sm:$0xff]  }
  0x22   : > { %835 = vmatpush3.bf16.msra.mxu0 %v923_v7  ;;  %v932_v16 = vld [vmem:[%s1070_s19 + $0xa0] sm:$0xff]   ;;  %v936_v20 = vld [vmem:[%s1070_s19 + $0x98] sm:$0xff]   ;;  %v940_v24 = vld [vmem:[%s1070_s19 + $0x90] sm:$0xff]  }
  0x23   : > { %857 = vmatpush3.bf16.msra.mxu1 %v924_v8  ;;  %836 = vmatprep.subr.bf16.mxu0 %v925_v9  ;;  %v941_v25 = vld [vmem:[%s1070_s19 + $0x48] sm:$0xff]   ;;  %v945_v29 = vld [vmem:[%s1070_s19 + $0x40] sm:$0xff]  }
  0x24   : > { %858 = vmatprep.subr.bf16.mxu1 %v926_v10  ;;  %v942_v26 = vld [vmem:[%s1070_s19 + $0xc8] sm:$0xff]   ;;  %v946_v30 = vld [vmem:[%s1070_s19 + $0xc0] sm:$0xff]  }
  0x25   : > { %v943_v27 = vld [vmem:[%s1070_s19 + $0x8] sm:$0xff]   ;;  %v947_v31 = vld [vmem:[%s1070_s19] sm:$0xff]  }
  0x26   : > { %837 = vmatpush3.bf16.msra.mxu0 %v927_v11  ;;  %v944_v28 = vld [vmem:[%s1070_s19 + $0x88] sm:$0xff]   ;;  %v948_v32 = vld [vmem:[%s1070_s19 + $0x80] sm:$0xff]  }
  0x27   : > { %859 = vmatpush3.bf16.msra.mxu1 %v928_v12  ;;  %838 = vmatprep.subr.bf16.mxu0 %v929_v13  ;;  %v285_v33 = vld [vmem:[%s1059_s30] sm:$0xff]  ;;  %v286_v34 = vld [vmem:[%s1059_s30 + $0x8] sm:$0xff] }
  0x28   : > { %860 = vmatprep.subr.bf16.mxu1 %v930_v14  ;;  %v792_v35 = vcombine.low %v285_v33, %v285_v33  ;;  %v793_v36 = vcombine.high %v285_v33, %v285_v33  ;;  %v794_v37 = vcombine.low %v286_v34, %v286_v34  ;;  %v795_v38 = vcombine.high %v286_v34, %v286_v34  ;;  %v284_v45 = vld [vmem:[#allocation2] sm:$0xff] }
  0x2a   : > { %839 = vmatpush3.bf16.msra.mxu0 %v931_v15  ;;  %589 = vmatprep.mubr.bf16.mxu0 %v793_v36 }
  0x2b   : > { %861 = vmatpush3.bf16.msra.mxu1 %v932_v16  ;;  %840 = vmatprep.subr.bf16.mxu0 %v933_v17 }
  0x2c   : > { %862 = vmatprep.subr.bf16.mxu1 %v934_v18  ;;  %629 = vmatprep.mubr.bf16.mxu1 %v795_v38 }
  0x2e   : > { %841 = vmatpush3.bf16.msra.mxu0 %v935_v19 }
  0x2f   : > { %863 = vmatpush3.bf16.msra.mxu1 %v936_v20  ;;  %842 = vmatprep.subr.bf16.mxu0 %v937_v21 }
  0x30   : > { %864 = vmatprep.subr.bf16.mxu1 %v938_v22 }
  0x32   : > { %843 = vmatpush3.bf16.msra.mxu0 %v939_v23 }
  0x33   : > { %865 = vmatpush3.bf16.msra.mxu1 %v940_v24  ;;  %844 = vmatprep.subr.bf16.mxu0 %v941_v25 }
  0x34   : > { %866 = vmatprep.subr.bf16.mxu1 %v942_v26 }
  0x36   : > { %845 = vmatpush3.bf16.msra.mxu0 %v943_v27 }
  0x37   : > { %867 = vmatpush3.bf16.msra.mxu1 %v944_v28  ;;  %846 = vmatprep.subr.bf16.mxu0 %v945_v29 }
  0x38   : > { %868 = vmatprep.subr.bf16.mxu1 %v946_v30 }
  0x3a   : > { %847 = vmatpush3.bf16.msra.mxu0 %v947_v31 }
  0x3b   : > { %869 = vmatpush3.bf16.msra.mxu1 %v948_v32 }
  0x3d   : > { %590 = vmatmul.mubr.bf16.vlgmr.msra.gmra.mxu0 %v792_v35 }
  0x3e   : > { %630 = vmatmul.mubr.bf16.vlgmr.msra.gmra.mxu1 %v794_v37 }
  0xfd   : > { %v848_v39 = vpop.f32.mrf.mxu0 }
  0xfe   : > { %v870_v40 = vpop.f32.mrf.mxu1 }
  0xff   : > { %v849_v41 = vpop.f32.mrf.mxu0 }
 0x100   : > { %v871_v42 = vpop.f32.mrf.mxu1  ;;  %v850_v43 = vadd.f32 %v849_v41, %v848_v39 }
 0x101   : > { %v872_v44 = vadd.f32 %v871_v42, %v870_v40  ;;  %v851_v46 = vpop.f32.mrf.mxu0 }
 0x102   : > { %v873_v47 = vpop.f32.mrf.mxu1 }
 0x103   : > { %v632_v48 = vadd.f32 %v872_v44, %v850_v43  ;;  %v852_v49 = vpop.f32.mrf.mxu0  ;;  %642 = sbr.rel (%p828_p9) target bundleno = 279 (0x117), region = 40 }
 0x104   : > { %v874_v50 = vpop.f32.mrf.mxu1 }
 0x105   : > { %v637_v51 = vadd.f32 %v632_v48, %v284_v45 }
 0x107   : > { %638 = vst [vmem:[#allocation2] sm:$0xff] %v637_v51 }
 0x108   : > { %v829_v53 = vld [vmem:[%s269_s27] ss:$0 sm:$0xff] }
 0x10e   : > { %v643_v52 = vld [vmem:[#allocation2] sm:$0xff] }
 0x10f   : > { %v651_v54 = vadd.f32 %v829_v53, %v643_v52 }
 0x111   : > { %vm652_vm0 = vcmp.gt.f32.partialorder %v651_v54, 0.0  ;;  %v653_v55 = vmul.f32 0.01, %v651_v54 }
 0x113   : > { %v654_v56 = vsel %vm652_vm0, %v651_v54, %v653_v55 }
 0x114   : > { %v655_v57 = vpack.c.bf16 %v654_v56, %v654_v56 }
 0x116   : > { %656 = vst [vmem:[%s1065_s7] sm:$0xf] %v655_v57 }
 0x117 PF: > { %s13_s16 = sadd.s32 1, %s991_s16   ;;  %s1133_s12 = smov %s983_s14 }
 0x118   : > { %p10_p10 = scmp.ge.s32.totalorder %s13_s16, 18   ;;  %s1134_s13 = smov %s987_s15 }
 0x119   : > { %s1135_s14 = smov %s1138_s17  ;;  %s1136_s15 = smov %s1142_s18 }
 0x11a   :  { %12 = sbr.rel (!%p10_p10) target bundleno = 3 (0x3), region = 76 }

// kernel: model_forward.7
= control target key start
LH: loop header
LB: loop body
LE: loop exit
PB: predicated region body
PF: predicated region fallthrough
CT: control target
= control target key end

     0   :  { %v1012_v39 = vmov 0.0   ;;  %vm1013_vm0 = vmmov 0   ;;  %s1283_s1 = inlined_call_operand.vmem [shape: bf16[512,128], index: 1, kind: input, shape index: {}]   ;;  %s1284_s0 = inlined_call_operand.vmem [shape: bf16[8,512], index: 0, kind: input, shape index: {}]   ;;  %s1285_s3 = inlined_call_operand.vmem [shape: bf16[128,128], index: 3, kind: input, shape index: {}]   ;;  %s1286_s5 = inlined_call_operand.vmem [shape: bf16[128,128], index: 5, kind: input, shape index: {}]   ;;  %s1287_s2 = inlined_call_operand.vmem [shape: f32[1,128], index: 2, kind: input, shape index: {}]   ;;  %s1288_s7 = inlined_call_operand.vmem [shape: bf16[128,128], index: 7, kind: input, shape index: {}]   ;;  %s1289_s4 = inlined_call_operand.vmem [shape: f32[1,128], index: 4, kind: input, shape index: {}]   ;;  %s1290_s6 = inlined_call_operand.vmem [shape: f32[1,128], index: 6, kind: input, shape index: {}]   ;;  %s1291_s8 = inlined_call_operand.vmem [shape: f32[1,128], index: 8, kind: input, shape index: {}]   ;;  %s1292_s9 = inlined_call_operand.vmem [shape: f32[8,128], index: 9, kind: output, shape index: {}]  }
   0x1   :  { %v948_v0 = vld [vmem:[%s1283_s1 + $0x78] sm:$0xff]   ;;  %v952_v4 = vld [vmem:[%s1283_s1 + $0x70] sm:$0xff]   ;;  %v956_v8 = vld [vmem:[%s1283_s1 + $0x68] sm:$0xff]  }
   0x2   :  { %v949_v1 = vld [vmem:[%s1283_s1 + $0xf8] sm:$0xff]   ;;  %815 = vmatprep.subr.bf16.mxu0 %v948_v0  ;;  %v953_v5 = vld [vmem:[%s1283_s1 + $0xf0] sm:$0xff]   ;;  %v957_v9 = vld [vmem:[%s1283_s1 + $0xe8] sm:$0xff]  }
   0x3   :  { %v950_v2 = vld [vmem:[%s1283_s1 + $0x38] sm:$0xff]   ;;  %837 = vmatprep.subr.bf16.mxu1 %v949_v1  ;;  %v954_v6 = vld [vmem:[%s1283_s1 + $0x30] sm:$0xff]   ;;  %v958_v10 = vld [vmem:[%s1283_s1 + $0x28] sm:$0xff]  }
   0x4   :  { %v951_v3 = vld [vmem:[%s1283_s1 + $0xb8] sm:$0xff]   ;;  %816 = vmatpush3.bf16.msra.mxu0 %v950_v2  ;;  %v955_v7 = vld [vmem:[%s1283_s1 + $0xb0] sm:$0xff]   ;;  %v959_v11 = vld [vmem:[%s1283_s1 + $0xa8] sm:$0xff]  }
   0x5   :  { %838 = vmatpush3.bf16.msra.mxu1 %v951_v3  ;;  %817 = vmatprep.subr.bf16.mxu0 %v952_v4  ;;  %v960_v12 = vld [vmem:[%s1283_s1 + $0x60] sm:$0xff]   ;;  %v964_v16 = vld [vmem:[%s1283_s1 + $0x58] sm:$0xff]   ;;  %v968_v20 = vld [vmem:[%s1283_s1 + $0x50] sm:$0xff]  }
   0x6   :  { %839 = vmatprep.subr.bf16.mxu1 %v953_v5  ;;  %v961_v13 = vld [vmem:[%s1283_s1 + $0xe0] sm:$0xff]   ;;  %v965_v17 = vld [vmem:[%s1283_s1 + $0xd8] sm:$0xff]   ;;  %v969_v21 = vld [vmem:[%s1283_s1 + $0xd0] sm:$0xff]  }
   0x7   :  { %v962_v14 = vld [vmem:[%s1283_s1 + $0x20] sm:$0xff]   ;;  %v966_v18 = vld [vmem:[%s1283_s1 + $0x18] sm:$0xff]   ;;  %v970_v22 = vld [vmem:[%s1283_s1 + $0x10] sm:$0xff]  }
   0x8   :  { %818 = vmatpush3.bf16.msra.mxu0 %v954_v6  ;;  %v963_v15 = vld [vmem:[%s1283_s1 + $0xa0] sm:$0xff]   ;;  %v967_v19 = vld [vmem:[%s1283_s1 + $0x98] sm:$0xff]   ;;  %v971_v23 = vld [vmem:[%s1283_s1 + $0x90] sm:$0xff]  }
   0x9   :  { %840 = vmatpush3.bf16.msra.mxu1 %v955_v7  ;;  %819 = vmatprep.subr.bf16.mxu0 %v956_v8  ;;  %v972_v24 = vld [vmem:[%s1283_s1 + $0x48] sm:$0xff]   ;;  %v976_v28 = vld [vmem:[%s1283_s1 + $0x40] sm:$0xff]   ;;  %v984_v38 = vld [vmem:[%s1285_s3 + $0x38] sm:$0xff]  }
   0xa   :  { %841 = vmatprep.subr.bf16.mxu1 %v957_v9  ;;  %v973_v25 = vld [vmem:[%s1283_s1 + $0xc8] sm:$0xff]   ;;  %v977_v29 = vld [vmem:[%s1283_s1 + $0xc0] sm:$0xff]   ;;  %v985_v40 = vld [vmem:[%s1285_s3 + $0x30] sm:$0xff]  }
   0xb   :  { %v974_v26 = vld [vmem:[%s1283_s1 + $0x8] sm:$0xff]   ;;  %v978_v30 = vld [vmem:[%s1283_s1] sm:$0xff]   ;;  %v988_v43 = vld [vmem:[%s1285_s3 + $0x18] sm:$0xff]  }
   0xc   :  { %820 = vmatpush3.bf16.msra.mxu0 %v958_v10  ;;  %v975_v27 = vld [vmem:[%s1283_s1 + $0x88] sm:$0xff]   ;;  %v979_v31 = vld [vmem:[%s1283_s1 + $0x80] sm:$0xff]   ;;  %v989_v44 = vld [vmem:[%s1285_s3 + $0x10] sm:$0xff]  }
   0xd   :  { %842 = vmatpush3.bf16.msra.mxu1 %v959_v11  ;;  %821 = vmatprep.subr.bf16.mxu0 %v960_v12  ;;  %v33_v32 = vld [vmem:[%s1284_s0] sm:$0xff]  ;;  %v34_v33 = vld [vmem:[%s1284_s0 + $0x8] sm:$0xff]  ;;  %v992_v47 = vld [vmem:[%s1286_s5 + $0x38] sm:$0xff]  }
   0xe   :  { %843 = vmatprep.subr.bf16.mxu1 %v961_v13  ;;  %v752_v34 = vcombine.low %v33_v32, %v33_v32  ;;  %v753_v35 = vcombine.high %v33_v32, %v33_v32  ;;  %v754_v36 = vcombine.low %v34_v33, %v34_v33  ;;  %v755_v37 = vcombine.high %v34_v33, %v34_v33  ;;  %v986_v41 = vld [vmem:[%s1285_s3 + $0x28] sm:$0xff]   ;;  %v987_v42 = vld [vmem:[%s1285_s3 + $0x20] sm:$0xff]   ;;  %v993_v48 = vld [vmem:[%s1286_s5 + $0x30] sm:$0xff]  }
   0xf   :  { %v990_v45 = vld [vmem:[%s1285_s3 + $0x8] sm:$0xff]   ;;  %v991_v46 = vld [vmem:[%s1285_s3] sm:$0xff]   ;;  %v996_v51 = vld [vmem:[%s1286_s5 + $0x18] sm:$0xff]  }
  0x10   :  { %822 = vmatpush3.bf16.msra.mxu0 %v962_v14  ;;  %344 = vmatprep.mubr.bf16.mxu0 %v753_v35  ;;  %v994_v49 = vld [vmem:[%s1286_s5 + $0x28] sm:$0xff]   ;;  %v995_v50 = vld [vmem:[%s1286_s5 + $0x20] sm:$0xff]   ;;  %v997_v52 = vld [vmem:[%s1286_s5 + $0x10] sm:$0xff]  }
  0x11   :  { %844 = vmatpush3.bf16.msra.mxu1 %v963_v15  ;;  %823 = vmatprep.subr.bf16.mxu0 %v964_v16  ;;  %v751_v55 = vld [vmem:[%s1287_s2] ss:$0 sm:$0xff]  ;;  %v998_v5 = vld [vmem:[%s1286_s5 + $0x8] sm:$0xff]   ;;  %v1000_v7 = vld [vmem:[%s1288_s7 + $0x38] sm:$0xff]  }
  0x12   :  { %845 = vmatprep.subr.bf16.mxu1 %v965_v17  ;;  %384 = vmatprep.mubr.bf16.mxu1 %v755_v37  ;;  %v999_v6 = vld [vmem:[%s1286_s5] sm:$0xff]   ;;  %v1001_v8 = vld [vmem:[%s1288_s7 + $0x30] sm:$0xff]   ;;  %v1002_v9 = vld [vmem:[%s1288_s7 + $0x28] sm:$0xff]  }
  0x13   :  { %v1003_v10 = vld [vmem:[%s1288_s7 + $0x20] sm:$0xff]   ;;  %v1004_v11 = vld [vmem:[%s1288_s7 + $0x18] sm:$0xff]   ;;  %v1005_v12 = vld [vmem:[%s1288_s7 + $0x10] sm:$0xff]  }
  0x14   :  { %824 = vmatpush3.bf16.msra.mxu0 %v966_v18  ;;  %v788_v13 = vld [vmem:[%s1289_s4] ss:$0 sm:$0xff] }
  0x15   :  { %846 = vmatpush3.bf16.msra.mxu1 %v967_v19  ;;  %825 = vmatprep.subr.bf16.mxu0 %v968_v20  ;;  %v806_v33 = vld [vmem:[%s1291_s8] ss:$0 sm:$0xff] }
  0x16   :  { %847 = vmatprep.subr.bf16.mxu1 %v969_v21 }
  0x18   :  { %826 = vmatpush3.bf16.msra.mxu0 %v970_v22  ;;  %v1006_v22 = vld [vmem:[%s1288_s7 + $0x8] sm:$0xff]  }
  0x19   :  { %848 = vmatpush3.bf16.msra.mxu1 %v971_v23  ;;  %827 = vmatprep.subr.bf16.mxu0 %v972_v24  ;;  %v1007_v23 = vld [vmem:[%s1288_s7] sm:$0xff]  }
  0x1a   :  { %849 = vmatprep.subr.bf16.mxu1 %v973_v25  ;;  %v797_v24 = vld [vmem:[%s1290_s6] ss:$0 sm:$0xff] }
  0x1c   :  { %828 = vmatpush3.bf16.msra.mxu0 %v974_v26 }
  0x1d   :  { %850 = vmatpush3.bf16.msra.mxu1 %v975_v27  ;;  %829 = vmatprep.subr.bf16.mxu0 %v976_v28 }
  0x1e   :  { %851 = vmatprep.subr.bf16.mxu1 %v977_v29 }
  0x20   :  { %830 = vmatpush3.bf16.msra.mxu0 %v978_v30 }
  0x21   :  { %852 = vmatpush3.bf16.msra.mxu1 %v979_v31  ;;  %886 = vmatprep.subr.bf16.mxu0 %v1012_v39 }
  0x22   :  { %906 = vmatprep.subr.bf16.mxu1 %v1012_v39 }
  0x23   :  { %345 = vmatmul.mubr.bf16.vlgmr.msra.gmra.mxu0 %v752_v34 }
  0x24   :  { %385 = vmatmul.mubr.bf16.vlgmr.msra.gmra.mxu1 %v754_v36  ;;  %887 = vmatpush3.bf16.msra.mxu0 %v984_v38 }
  0x25   :  { %888 = vmatprep.subr.bf16.mxu0 %v1012_v39  ;;  %902 = vmatprep.mubr.msk.bf16.mxu0 %vm1013_vm0, %v1012_v39 }
  0x26   :  { %922 = vmatprep.mubr.msk.bf16.mxu1 %vm1013_vm0, %v1012_v39  ;;  %907 = vmatpush3.bf16.msra.mxu1 %v992_v47 }
  0x27   :  { %908 = vmatprep.subr.bf16.mxu1 %v1012_v39 }
  0x28   :  { %889 = vmatpush3.bf16.msra.mxu0 %v985_v40 }
  0x29   :  { %890 = vmatprep.subr.bf16.mxu0 %v1012_v39 }
  0x2a   :  { %909 = vmatpush3.bf16.msra.mxu1 %v993_v48 }
  0x2b   :  { %910 = vmatprep.subr.bf16.mxu1 %v1012_v39 }
  0x2c   :  { %891 = vmatpush3.bf16.msra.mxu0 %v986_v41 }
  0x2d   :  { %892 = vmatprep.subr.bf16.mxu0 %v1012_v39 }
  0x2e   :  { %911 = vmatpush3.bf16.msra.mxu1 %v994_v49 }
  0x2f   :  { %912 = vmatprep.subr.bf16.mxu1 %v1012_v39 }
  0x30   :  { %893 = vmatpush3.bf16.msra.mxu0 %v987_v42 }
  0x31   :  { %894 = vmatprep.subr.bf16.mxu0 %v1012_v39 }
  0x32   :  { %913 = vmatpush3.bf16.msra.mxu1 %v995_v50 }
  0x33   :  { %914 = vmatprep.subr.bf16.mxu1 %v1012_v39 }
  0x34   :  { %895 = vmatpush3.bf16.msra.mxu0 %v988_v43 }
  0x35   :  { %896 = vmatprep.subr.bf16.mxu0 %v1012_v39 }
  0x36   :  { %915 = vmatpush3.bf16.msra.mxu1 %v996_v51 }
  0x37   :  { %916 = vmatprep.subr.bf16.mxu1 %v1012_v39 }
  0x38   :  { %897 = vmatpush3.bf16.msra.mxu0 %v989_v44 }
  0x39   :  { %898 = vmatprep.subr.bf16.mxu0 %v1012_v39 }
  0x3a   :  { %917 = vmatpush3.bf16.msra.mxu1 %v997_v52 }
  0x3b   :  { %918 = vmatprep.subr.bf16.mxu1 %v1012_v39 }
  0x3c   :  { %899 = vmatpush3.bf16.msra.mxu0 %v990_v45 }
  0x3d   :  { %900 = vmatprep.subr.bf16.mxu0 %v1012_v39 }
  0x3e   :  { %919 = vmatpush3.bf16.msra.mxu1 %v998_v5 }
  0x3f   :  { %920 = vmatprep.subr.bf16.mxu1 %v1012_v39 }
  0x40   :  { %901 = vmatpush3.bf16.msra.mxu0 %v991_v46 }
  0x41   :  { %926 = vmatprep.subr.bf16.mxu0 %v1012_v39 }
  0x42   :  { %921 = vmatpush3.bf16.msra.mxu1 %v999_v6 }
  0xe3   :  { %v831_v53 = vpop.f32.mrf.mxu0 }
  0xe4   :  { %v853_v54 = vpop.f32.mrf.mxu1 }
  0xe5   :  { %v832_v56 = vpop.f32.mrf.mxu0 }
  0xe6   :  { %v854_v57 = vpop.f32.mrf.mxu1  ;;  %v833_v58 = vadd.f32 %v832_v56, %v831_v53 }
  0xe7   :  { %v834_v59 = vpop.f32.mrf.mxu0  ;;  %v855_v62 = vadd.f32 %v854_v57, %v853_v54 }
  0xe8   :  { %v856_v60 = vpop.f32.mrf.mxu1  ;;  %v347_v61 = vadd.f32 %v833_v58, %v751_v55 }
  0xe9   :  { %v835_v63 = vpop.f32.mrf.mxu0 }
  0xea   :  { %v857_v0 = vpop.f32.mrf.mxu1  ;;  %v387_v1 = vadd.f32 %v855_v62, %v347_v61 }
  0xec   :  { %vm392_vm1 = vcmp.gt.f32.partialorder %v387_v1, 0.0  ;;  %v393_v2 = vmul.f32 0.01, %v387_v1 }
  0xee   :  { %v394_v3 = vsel %vm392_vm1, %v387_v1, %v393_v2 }
  0xef   :  { %v395_v4 = vpack.c.bf16 %v394_v3, %v394_v3 }
  0xf1   :  { %903 = vmatmul.mubr.bf16.vlgmr.msra.gmra.mxu0 %v395_v4 }
  0xf2   :  { %942 = vmatprep.mubr.msk.bf16.mxu0 %vm1013_vm0, %v1012_v39  ;;  %927 = vmatpush3.bf16.msra.mxu0 %v1000_v7 }
  0xf3   :  { %928 = vmatprep.subr.bf16.mxu0 %v1012_v39 }
  0xf6   :  { %929 = vmatpush3.bf16.msra.mxu0 %v1001_v8 }
  0xf7   :  { %930 = vmatprep.subr.bf16.mxu0 %v1012_v39 }
  0xfa   :  { %931 = vmatpush3.bf16.msra.mxu0 %v1002_v9 }
  0xfb   :  { %932 = vmatprep.subr.bf16.mxu0 %v1012_v39 }
  0xfe   :  { %933 = vmatpush3.bf16.msra.mxu0 %v1003_v10 }
  0xff   :  { %934 = vmatprep.subr.bf16.mxu0 %v1012_v39 }
 0x102   :  { %935 = vmatpush3.bf16.msra.mxu0 %v1004_v11 }
 0x103   :  { %936 = vmatprep.subr.bf16.mxu0 %v1012_v39 }
 0x106   :  { %937 = vmatpush3.bf16.msra.mxu0 %v1005_v12 }
 0x107   :  { %938 = vmatprep.subr.bf16.mxu0 %v1012_v39 }
 0x10a   :  { %939 = vmatpush3.bf16.msra.mxu0 %v1006_v22 }
 0x10b   :  { %940 = vmatprep.subr.bf16.mxu0 %v1012_v39 }
 0x10e   :  { %941 = vmatpush3.bf16.msra.mxu0 %v1007_v23 }
 0x1b1   :  { %v501_v14 = vpop.f32.mrf.mxu0 }
 0x1b2   :  { %v502_v15 = vadd.f32 %v788_v13, %v501_v14 }
 0x1b3   :  { %v904_v16 = vpop.f32.mrf.mxu0 }
 0x1b4   :  { %vm507_vm2 = vcmp.gt.f32.partialorder %v502_v15, 0.0  ;;  %v508_v17 = vmul.f32 0.01, %v502_v15 }
 0x1b5   :  { %v504_v18 = vpop.f32.mrf.mxu0 }
 0x1b6   :  { %v509_v19 = vsel %vm507_vm2, %v502_v15, %v508_v17 }
 0x1b7   :  { %v510_v20 = vpack.c.bf16 %v509_v19, %v509_v19  ;;  %v905_v21 = vpop.f32.mrf.mxu0 }
 0x1b9   :  { %923 = vmatmul.mubr.bf16.vlgmr.msra.gmra.mxu1 %v510_v20 }
 0x279   :  { %v616_v25 = vpop.f32.mrf.mxu1 }
 0x27a   :  { %v617_v26 = vadd.f32 %v797_v24, %v616_v25 }
 0x27b   :  { %v924_v27 = vpop.f32.mrf.mxu1 }
 0x27c   :  { %vm622_vm3 = vcmp.gt.f32.partialorder %v617_v26, 0.0  ;;  %v623_v28 = vmul.f32 0.01, %v617_v26 }
 0x27d   :  { %v619_v29 = vpop.f32.mrf.mxu1 }
 0x27e   :  { %v624_v30 = vsel %vm622_vm3, %v617_v26, %v623_v28 }
 0x27f   :  { %v625_v31 = vpack.c.bf16 %v624_v30, %v624_v30  ;;  %v925_v32 = vpop.f32.mrf.mxu1 }
 0x281   :  { %943 = vmatmul.mubr.bf16.vlgmr.msra.gmra.mxu0 %v625_v31 }
 0x341   :  { %v731_v34 = vpop.f32.mrf.mxu0 }
 0x342   :  { %v732_v35 = vadd.f32 %v806_v33, %v731_v34 }
 0x343   :  { %v944_v36 = vpop.f32.mrf.mxu0 }
 0x344   :  { %737 = vmax.xlane.f32.xlu0 %v732_v35 }
 0x345   :  { %v734_v37 = vpop.f32.mrf.mxu0 }
 0x347   :  { %v945_v38 = vpop.f32.mrf.mxu0 }
 0x3cd   :  { %v738_v39 = vpop.xlane.xlu0 %737 }
 0x3ce   :  { %v739_v40 = vsub.f32 %v732_v35, %v738_v39 }
 0x3d0   :  { %v740_v41 = vmul.f32 1.442695, %v739_v40 }
 0x3d2   :  { %1008 = vpow2.f32 %v740_v41 }
 0x3df   :  { %v1009_v42 = vpop.eup %1008 }
 0x3e0   :  { %742 = vadd.xlane.f32.xlu0 %v1009_v42 }
 0x469   :  { %v743_v43 = vpop.xlane.xlu0 %742 }
 0x46a   :  { %1010 = vrcp.f32 %v743_v43 }
 0x477   :  { %v1011_v44 = vpop.eup %1010 }
 0x478   :  { %v745_v45 = vmul.f32 %v1011_v44, %v1009_v42 }
 0x47a   :  { %746 = vst [vmem:[%s1292_s9] sm:$0xff] %v745_v45 }

</bundles_post_ra>
